<compile_context>
chip_gen: v7x
topology: tpu7x:2x2x1
jax: 0.10.0
libtpu: 0.0.40
codegen_flags: <defaults>
</compile_context>

<pallas_src>
import functools

import jax
import jax.numpy as jnp
from jax.experimental import pallas as pl
from jax.experimental.pallas import tpu as pltpu

LN_EPS = 1e-12        # TF-style LayerNorm eps used by the reference module


# --------------------------------------------------------------------------
# VMEM budget / block sizing helpers
# --------------------------------------------------------------------------
@functools.lru_cache(maxsize=None)
def _vmem_limit_bytes():
    cap = None
    try:
        cap = getattr(pltpu.get_tpu_info(), "vmem_capacity_bytes", None)
    except Exception:
        cap = None
    if not cap:
        cap = 128 * 1024 * 1024            # v5e / v6e; v7x is 64 MiB per TC
    # leave ~25% headroom for compiler scratch / semaphores / output buffers:
    # ~48 MiB on v7x, ~96 MiB on v5e/v6e.
    return int(min(cap * 3 // 4, 96 * 1024 * 1024))


def _pick_batch_block(n, seq_len, d, d_hidden, weight_bytes, act_itemsize, vmem_limit):
    """Batch elements per grid step for the fused per-layer kernel."""
    # Rough per-batch-element footprint of live in-kernel activations:
    #   f32: x, x1, xn, xn2, out (5*D) + qkv (3*D) + MLP hidden pre/post gelu (2*H4)
    #   compute dtype: qkv cast (3*D) + attn scratch (D) + double-buffered io (4*D)
    per_elem = seq_len * (4 * (5 * d + 3 * d + 2 * d_hidden)
                          + act_itemsize * (3 * d + d + 4 * d))
    budget = max(vmem_limit - weight_bytes - (8 << 20), per_elem)
    cap = max(1, min(n, budget // per_elem, 256))
    if n >= 2:
        cap = min(cap, n // 2)            # >= 2 grid steps: v7x dual-TC / megacore
    for bn in range(int(cap), 0, -1):     # largest divisor of n <= cap
        if n % bn == 0:
            return bn
    return 1


def _layernorm_f32(x, g, b):
    x = x.astype(jnp.float32)
    u = jnp.mean(x, axis=-1, keepdims=True)
    s = jnp.mean((x - u) ** 2, axis=-1, keepdims=True)
    return g * ((x - u) * jax.lax.rsqrt(s + LN_EPS)) + b


# --------------------------------------------------------------------------
# Fused per-layer kernel: ln_1 + QKV + MHA + out_proj + res + ln_2 + MLP + res
#   x block: (bn, L, D) -> out block: (bn, L, D)   (lane-dense last dim)
# --------------------------------------------------------------------------
def layer_kernel(x_ref, g1_ref, b1_ref, w_in_ref, b_in_ref,
                 wo_ref, bo_ref, g2_ref, b2_ref,
                 wfc_ref, bfc_ref, wpj_ref, bpj_ref,
                 o_ref, attn_sc, *, num_heads, head_dim):
    bn, L, D = x_ref.shape
    M = bn * L
    cdt = w_in_ref.dtype                                    # matmul-operand dtype

    x = x_ref[...].astype(jnp.float32).reshape(M, D)        # residual stream (f32)

    # ---- ln_1 + QKV in-projection (1/sqrt(hd) folded into Q weight columns) ----
    xn = _layernorm_f32(x, g1_ref[...], b1_ref[...])
    qkv = (jnp.dot(xn.astype(cdt), w_in_ref[...],
                   preferred_element_type=jnp.float32) + b_in_ref[...])
    qkv = qkv.reshape(bn, L, 3 * D).astype(cdt)

    # ---- multi-head self-attention; per-head outputs stored directly ----
    # TODO(synk): for head_dim=64 process head pairs so q/k/v slices span 128 lanes.
    for h in range(num_heads):                               # static unroll over heads
        c = h * head_dim
        q = qkv[:, :, c:c + head_dim]
        k = qkv[:, :, D + c:D + c + head_dim]
        v = qkv[:, :, 2 * D + c:2 * D + c + head_dim]
        s = jnp.einsum("bqd,bkd->bqk", q, k,
                       preferred_element_type=jnp.float32)   # (bn, L, L) f32
        # TODO(synk): attn_mask is None in this config; a mask would be an additive bias on s.
        s = s - jnp.max(s, axis=-1, keepdims=True)
        e = jnp.exp(s)
        p = e * pl.reciprocal(jnp.sum(e, axis=-1, keepdims=True), approx=True)
        o = jnp.einsum("bqk,bkd->bqd", p.astype(cdt), v,
                       preferred_element_type=jnp.float32)
        attn_sc[:, :, c:c + head_dim] = o.astype(attn_sc.dtype)

    # ---- out-projection + residual ----
    a = attn_sc[...].reshape(M, D)
    x1 = (x + jnp.dot(a, wo_ref[...], preferred_element_type=jnp.float32)
          + bo_ref[...])

    # ---- ln_2 + c_fc + QuickGELU + c_proj + residual ----
    xn2 = _layernorm_f32(x1, g2_ref[...], b2_ref[...])
    hdn = (jnp.dot(xn2.astype(cdt), wfc_ref[...],
                   preferred_element_type=jnp.float32) + bfc_ref[...])
    # TODO(synk): on v6e/v7x the QuickGELU elementwise could run in bf16; kept f32 (v5e-safe).
    hdn = hdn * jax.nn.sigmoid(1.702 * hdn)
    out = (x1 + jnp.dot(hdn.astype(cdt), wpj_ref[...],
                        preferred_element_type=jnp.float32) + bpj_ref[...])
    o_ref[...] = out.reshape(bn, L, D).astype(o_ref.dtype)


def _layer_call(x2, p, num_heads, head_dim, *, batch_block, vmem_limit):
    N, L, D = x2.shape
    bn = batch_block
    cdt = p["w_in"].dtype
    H4 = p["w_fc"].shape[1]
    M = N * L

    weight_bytes = (3 * D * D + D * D + D * H4 + H4 * D) * cdt.itemsize
    flops = 2 * M * D * (3 * D + D + 2 * H4) + 4 * N * num_heads * L * L * head_dim
    transcendentals = N * num_heads * L * (L + 1) + M * (H4 + 2)
    bytes_acc = 2 * M * D * x2.dtype.itemsize + weight_bytes

    kern = functools.partial(layer_kernel, num_heads=num_heads, head_dim=head_dim)
    block = pl.BlockSpec((bn, L, D), lambda i: (i, 0, 0))
    # Untiled, VMEM-resident weights: single copy, no per-step DMA, no double buffer.
    wspec = pl.BlockSpec(memory_space=pltpu.MemorySpace.VMEM)
    # TODO(synk): for D >= 1024 on v7x, optionally tile the 4D hidden dim of the MLP.

    return pl.pallas_call(
        kern,
        out_shape=jax.ShapeDtypeStruct((N, L, D), x2.dtype),
        grid=(N // bn,),
        in_specs=[block] + [wspec] * 12,
        out_specs=block,
        scratch_shapes=[pltpu.VMEM((bn, L, D), cdt)],        # per-head attention slab
        input_output_aliases={0: 0},                         # residual updated in place
        compiler_params=pltpu.CompilerParams(
            dimension_semantics=("parallel",),
            vmem_limit_bytes=vmem_limit),
        cost_estimate=pl.CostEstimate(
            flops=int(flops), transcendentals=int(transcendentals),
            bytes_accessed=int(bytes_acc)),
    )(x2, p["ln1_g"], p["ln1_b"], p["w_in"], p["b_in"],
      p["w_out"], p["b_out"], p["ln2_g"], p["ln2_b"],
      p["w_fc"], p["b_fc"], p["w_pj"], p["b_pj"])


# --------------------------------------------------------------------------
# Parameter prep: fold 1/sqrt(hd) into Q projection, cast matmul weights
# --------------------------------------------------------------------------
def prepare_params(params, num_heads, compute_dtype):
    D = params[0]["w_in"].shape[0]
    hd = D // num_heads
    scale = float(hd) ** -0.5
    prepped = []
    for p in params:
        w_in = jnp.concatenate([p["w_in"][:, :D] * scale, p["w_in"][:, D:]], axis=1)
        b_in = jnp.concatenate([p["b_in"][:, :D] * scale, p["b_in"][:, D:]], axis=1)
        prepped.append(dict(
            ln1_g=p["ln1_g"].astype(jnp.float32),
            ln1_b=p["ln1_b"].astype(jnp.float32),
            w_in=w_in.astype(compute_dtype),
            b_in=b_in.astype(jnp.float32),
            w_out=p["w_out"].astype(compute_dtype),
            b_out=p["b_out"].astype(jnp.float32),
            ln2_g=p["ln2_g"].astype(jnp.float32),
            ln2_b=p["ln2_b"].astype(jnp.float32),
            w_fc=p["w_fc"].astype(compute_dtype),
            b_fc=p["b_fc"].astype(jnp.float32),
            w_pj=p["w_pj"].astype(compute_dtype),
            b_pj=p["b_pj"].astype(jnp.float32),
        ))
    return prepped


# --------------------------------------------------------------------------
# TemporalTransformer forward (Pallas path)
# --------------------------------------------------------------------------
@functools.partial(jax.jit, static_argnames=("num_heads", "compute_dtype"))
def _forward(x, params, *, num_heads, compute_dtype):
    L, N, D = x.shape
    hd = D // num_heads
    p_list = prepare_params(params, num_heads, compute_dtype)
    H4 = p_list[0]["w_fc"].shape[1]

    vmem_limit = _vmem_limit_bytes()
    weight_bytes = (3 * D * D + D * D + D * H4 + H4 * D) * jnp.dtype(compute_dtype).itemsize
    bn = _pick_batch_block(N, L, D, H4, weight_bytes,
                           jnp.dtype(compute_dtype).itemsize, vmem_limit)

    # One global (L, N, D) -> (N, L, D) transpose so each grid block holds
    # complete batch elements; transposed back once at the end.  The residual
    # stream is carried between layers in the input dtype (f32 here).
    x2 = jnp.transpose(x, (1, 0, 2))
    for p in p_list:
        x2 = _layer_call(x2, p, num_heads, hd, batch_block=bn, vmem_limit=vmem_limit)
    return jnp.transpose(x2, (1, 0, 2)).astype(x.dtype)
    # TODO(synk): grad_checkpointing is training-only (backward recompute); forward unchanged.


def temporal_transformer(x, params, num_heads, compute_dtype=None):
    cdt = jnp.dtype(compute_dtype) if compute_dtype is not None else jnp.dtype(x.dtype)
    return _forward(x, params, num_heads=int(num_heads), compute_dtype=cdt)


# --------------------------------------------------------------------------
# Pure-JAX reference (for correctness check)
# --------------------------------------------------------------------------
def reference(x, params, num_heads):
    L, N, D = x.shape
    H = num_heads
    hd = D // H
    scale = float(hd) ** -0.5

    def ln(v, g, b):
        u = v.mean(-1, keepdims=True)
        s = ((v - u) ** 2).mean(-1, keepdims=True)
        return g.reshape(-1) * ((v - u) / jnp.sqrt(s + LN_EPS)) + b.reshape(-1)

    for p in params:
        xn = ln(x, p["ln1_g"], p["ln1_b"])
        qkv = xn @ p["w_in"] + p["b_in"].reshape(-1)
        q, k, v = jnp.split(qkv, 3, axis=-1)
        heads = lambda t: t.reshape(L, N, H, hd).transpose(1, 2, 0, 3)   # (N,H,L,hd)
        qh, kh, vh = heads(q), heads(k), heads(v)
        s = jnp.einsum("nhld,nhmd->nhlm", qh * scale, kh)
        pw = jax.nn.softmax(s, axis=-1)
        a = jnp.einsum("nhlm,nhmd->nhld", pw, vh)
        a = a.transpose(2, 0, 1, 3).reshape(L, N, D)
        x = x + a @ p["w_out"] + p["b_out"].reshape(-1)
        xn2 = ln(x, p["ln2_g"], p["ln2_b"])
        h = xn2 @ p["w_fc"] + p["b_fc"].reshape(-1)
        h = h * jax.nn.sigmoid(1.702 * h)
        x = x + h @ p["w_pj"] + p["b_pj"].reshape(-1)
    return x


# --------------------------------------------------------------------------
# Deterministic parameter init (shapes from ResidualAttentionBlock.__init__)
# --------------------------------------------------------------------------
def init_params(key, width, layers):
    D = width
    params = []
    for l in range(layers):
        ks = jax.random.split(jax.random.fold_in(key, l), 8)
        s_in = 1.0 / (D ** 0.5)
        s_hid = 1.0 / ((4 * D) ** 0.5)
        p = dict(
            ln1_g=jnp.ones((1, D), jnp.float32),
            ln1_b=jnp.zeros((1, D), jnp.float32),
            w_in=(jax.random.normal(ks[0], (3 * D, D), jnp.float32) * s_in).T,
            b_in=jax.random.normal(ks[1], (1, 3 * D), jnp.float32) * 0.01,
            w_out=(jax.random.normal(ks[2], (D, D), jnp.float32) * s_in).T,
            b_out=jax.random.normal(ks[3], (1, D), jnp.float32) * 0.01,
            ln2_g=jnp.ones((1, D), jnp.float32),
            ln2_b=jnp.zeros((1, D), jnp.float32),
            w_fc=(jax.random.normal(ks[4], (4 * D, D), jnp.float32) * s_in).T,
            b_fc=jax.random.normal(ks[5], (1, 4 * D), jnp.float32) * 0.01,
            w_pj=(jax.random.normal(ks[6], (D, 4 * D), jnp.float32) * s_hid).T,
            b_pj=jax.random.normal(ks[7], (1, D), jnp.float32) * 0.01,
        )
        params.append(p)
    return params


if __name__ == "__main__":
    L, N, width, heads, layers = 8, 2, 32, 4, 2

    key = jax.random.PRNGKey(0)
    k_x, k_p = jax.random.split(key)
    x = jax.random.normal(k_x, (L, N, width), jnp.float32)
    params = init_params(k_p, width, layers)

    ref = jax.block_until_ready(reference(x, params, heads))

    # f32 path (tight check)
    out = jax.block_until_ready(temporal_transformer(x, params, heads))
    assert out.shape == (L, N, width) and out.dtype == jnp.float32
    max_err = float(jnp.max(jnp.abs(out - ref)))
    assert max_err < 2e-2, f"f32 mismatch vs reference: max abs err {max_err}"

    # bf16 matmul-operand path (recommended production config on v5e/v6e/v7x);
    # residual stream stays f32 so error does not compound with depth.
    out_bf16 = jax.block_until_ready(
        temporal_transformer(x, params, heads, compute_dtype=jnp.bfloat16))
    assert out_bf16.shape == (L, N, width) and out_bf16.dtype == jnp.float32
    max_err_bf16 = float(jnp.max(jnp.abs(out_bf16 - ref)))
    assert max_err_bf16 < 0.5, f"bf16 mismatch vs reference: max abs err {max_err_bf16}"

    print("KERNEL_OK")
</pallas_src>

<mosaic_0001>
module attributes {stable_mosaic.version = 11 : i64} {
  func.func @layer_kernel(%arg0: i32, %arg1: memref<1x8x32xf32, #tpu.memory_space<vmem>>, %arg2: memref<1x32xf32, #tpu.memory_space<vmem>>, %arg3: memref<1x32xf32, #tpu.memory_space<vmem>>, %arg4: memref<32x96xf32, #tpu.memory_space<vmem>>, %arg5: memref<1x96xf32, #tpu.memory_space<vmem>>, %arg6: memref<32x32xf32, #tpu.memory_space<vmem>>, %arg7: memref<1x32xf32, #tpu.memory_space<vmem>>, %arg8: memref<1x32xf32, #tpu.memory_space<vmem>>, %arg9: memref<1x32xf32, #tpu.memory_space<vmem>>, %arg10: memref<32x128xf32, #tpu.memory_space<vmem>>, %arg11: memref<1x128xf32, #tpu.memory_space<vmem>>, %arg12: memref<128x32xf32, #tpu.memory_space<vmem>>, %arg13: memref<1x32xf32, #tpu.memory_space<vmem>>, %arg14: memref<1x8x32xf32, #tpu.memory_space<vmem>>, %arg15: memref<1x8x32xf32, #tpu.memory_space<vmem>>) attributes {dimension_semantics = [#tpu.dimension_semantics<parallel>], iteration_bounds = array<i64: 2>, scalar_prefetch = 0 : i64, scratch_operands = 1 : i64, tpu.core_type = #tpu.core_type<tc>, window_params = [{transform_indices = @transform_0, window_bounds = array<i64: 1, 8, 32>}, {pipeline_mode = #tpu.pipeline_mode<synchronous>, transform_indices = @transform_1, window_bounds = array<i64: 1, 32>}, {pipeline_mode = #tpu.pipeline_mode<synchronous>, transform_indices = @transform_2, window_bounds = array<i64: 1, 32>}, {pipeline_mode = #tpu.pipeline_mode<synchronous>, transform_indices = @transform_3, window_bounds = array<i64: 32, 96>}, {pipeline_mode = #tpu.pipeline_mode<synchronous>, transform_indices = @transform_4, window_bounds = array<i64: 1, 96>}, {pipeline_mode = #tpu.pipeline_mode<synchronous>, transform_indices = @transform_5, window_bounds = array<i64: 32, 32>}, {pipeline_mode = #tpu.pipeline_mode<synchronous>, transform_indices = @transform_6, window_bounds = array<i64: 1, 32>}, {pipeline_mode = #tpu.pipeline_mode<synchronous>, transform_indices = @transform_7, window_bounds = array<i64: 1, 32>}, {pipeline_mode = #tpu.pipeline_mode<synchronous>, transform_indices = @transform_8, window_bounds = array<i64: 1, 32>}, {pipeline_mode = #tpu.pipeline_mode<synchronous>, transform_indices = @transform_9, window_bounds = array<i64: 32, 128>}, {pipeline_mode = #tpu.pipeline_mode<synchronous>, transform_indices = @transform_10, window_bounds = array<i64: 1, 128>}, {pipeline_mode = #tpu.pipeline_mode<synchronous>, transform_indices = @transform_11, window_bounds = array<i64: 128, 32>}, {pipeline_mode = #tpu.pipeline_mode<synchronous>, transform_indices = @transform_12, window_bounds = array<i64: 1, 32>}, {transform_indices = @transform_13, window_bounds = array<i64: 1, 8, 32>}]} {
    %c0 = arith.constant 0 : index
    %c0_0 = arith.constant 0 : index
    %c0_1 = arith.constant 0 : index
    %0 = vector.load %arg1[%c0, %c0_0, %c0_1] : memref<1x8x32xf32, #tpu.memory_space<vmem>>, vector<1x8x32xf32>
    %1 = vector.shape_cast %0 : vector<1x8x32xf32> to vector<8x32xf32>
    %c0_2 = arith.constant 0 : index
    %c0_3 = arith.constant 0 : index
    %2 = vector.load %arg2[%c0_2, %c0_3] : memref<1x32xf32, #tpu.memory_space<vmem>>, vector<1x32xf32>
    %c0_4 = arith.constant 0 : index
    %c0_5 = arith.constant 0 : index
    %3 = vector.load %arg3[%c0_4, %c0_5] : memref<1x32xf32, #tpu.memory_space<vmem>>, vector<1x32xf32>
    %cst = arith.constant dense<0.000000e+00> : vector<8xf32>
    %4 = vector.multi_reduction <add>, %1, %cst [1] : vector<8x32xf32> to vector<8xf32>
    %5 = vector.shape_cast %4 : vector<8xf32> to vector<8x1xf32>
    %cst_6 = arith.constant 3.200000e+01 : f32
    %6 = vector.broadcast %cst_6 : f32 to vector<8x1xf32>
    %7 = arith.divf %5, %6 : vector<8x1xf32>
    %8 = vector.broadcast %7 : vector<8x1xf32> to vector<8x32xf32>
    %9 = arith.subf %1, %8 : vector<8x32xf32>
    %10 = arith.mulf %9, %9 : vector<8x32xf32>
    %cst_7 = arith.constant dense<0.000000e+00> : vector<8xf32>
    %11 = vector.multi_reduction <add>, %10, %cst_7 [1] : vector<8x32xf32> to vector<8xf32>
    %12 = vector.shape_cast %11 : vector<8xf32> to vector<8x1xf32>
    %cst_8 = arith.constant 3.200000e+01 : f32
    %13 = vector.broadcast %cst_8 : f32 to vector<8x1xf32>
    %14 = arith.divf %12, %13 : vector<8x1xf32>
    %15 = vector.broadcast %7 : vector<8x1xf32> to vector<8x32xf32>
    %16 = arith.subf %1, %15 : vector<8x32xf32>
    %cst_9 = arith.constant 9.99999996E-13 : f32
    %17 = vector.broadcast %cst_9 : f32 to vector<8x1xf32>
    %18 = arith.addf %14, %17 : vector<8x1xf32>
    %19 = math.rsqrt %18 : vector<8x1xf32>
    %20 = vector.broadcast %19 : vector<8x1xf32> to vector<8x32xf32>
    %21 = arith.mulf %16, %20 : vector<8x32xf32>
    %22 = vector.broadcast %2 : vector<1x32xf32> to vector<8x32xf32>
    %23 = arith.mulf %22, %21 : vector<8x32xf32>
    %24 = vector.broadcast %3 : vector<1x32xf32> to vector<8x32xf32>
    %25 = arith.addf %23, %24 : vector<8x32xf32>
    %c0_10 = arith.constant 0 : index
    %c0_11 = arith.constant 0 : index
    %26 = vector.load %arg4[%c0_10, %c0_11] : memref<32x96xf32, #tpu.memory_space<vmem>>, vector<32x96xf32>
    %cst_12 = arith.constant dense<0.000000e+00> : vector<8x96xf32>
    %27 = tpu.matmul %25, %26, %cst_12 {dimension_numbers = #tpu.dot_dimension_numbers<[1], [0], [0], [1], [0, 0, 1, 1], [], []>} : vector<8x32xf32>, vector<32x96xf32>, vector<8x96xf32> -> vector<8x96xf32>
    %c0_13 = arith.constant 0 : index
    %c0_14 = arith.constant 0 : index
    %28 = vector.load %arg5[%c0_13, %c0_14] : memref<1x96xf32, #tpu.memory_space<vmem>>, vector<1x96xf32>
    %29 = vector.broadcast %28 : vector<1x96xf32> to vector<8x96xf32>
    %30 = arith.addf %27, %29 : vector<8x96xf32>
    %31 = vector.shape_cast %30 : vector<8x96xf32> to vector<1x8x96xf32>
    %32 = vector.extract_strided_slice %31 {offsets = [0, 0, 0], sizes = [1, 8, 8], strides = [1, 1, 1]} : vector<1x8x96xf32> to vector<1x8x8xf32>
    %33 = vector.extract_strided_slice %31 {offsets = [0, 0, 32], sizes = [1, 8, 8], strides = [1, 1, 1]} : vector<1x8x96xf32> to vector<1x8x8xf32>
    %34 = vector.extract_strided_slice %31 {offsets = [0, 0, 64], sizes = [1, 8, 8], strides = [1, 1, 1]} : vector<1x8x96xf32> to vector<1x8x8xf32>
    "tpu.trace_start"() <{level = 10 : i32, message = "bqd,bkd->bqk"}> : () -> ()
    %cst_15 = arith.constant dense<0.000000e+00> : vector<1x8x8xf32>
    %35 = tpu.matmul %32, %33, %cst_15 {dimension_numbers = #tpu.dot_dimension_numbers<[2], [2], [1], [1], [0, 0, 0, 1, 1, 1], [0], [0]>} : vector<1x8x8xf32>, vector<1x8x8xf32>, vector<1x8x8xf32> -> vector<1x8x8xf32>
    "tpu.trace_stop"() : () -> ()
    %cst_16 = arith.constant dense<0xFF800000> : vector<1x8xf32>
    %36 = vector.multi_reduction <maximumf>, %35, %cst_16 [2] : vector<1x8x8xf32> to vector<1x8xf32>
    %37 = vector.shape_cast %36 : vector<1x8xf32> to vector<1x8x1xf32>
    %38 = vector.broadcast %37 : vector<1x8x1xf32> to vector<1x8x8xf32>
    %39 = arith.subf %35, %38 : vector<1x8x8xf32>
    %40 = math.exp %39 : vector<1x8x8xf32>
    %cst_17 = arith.constant dense<0.000000e+00> : vector<1x8xf32>
    %41 = vector.multi_reduction <add>, %40, %cst_17 [2] : vector<1x8x8xf32> to vector<1x8xf32>
    %42 = vector.shape_cast %41 : vector<1x8xf32> to vector<1x8x1xf32>
    %43 = tpu.reciprocal %42 {approx = true} : vector<1x8x1xf32> -> vector<1x8x1xf32>
    %44 = vector.broadcast %43 : vector<1x8x1xf32> to vector<1x8x8xf32>
    %45 = arith.mulf %40, %44 : vector<1x8x8xf32>
    "tpu.trace_start"() <{level = 10 : i32, message = "bqk,bkd->bqd"}> : () -> ()
    %cst_18 = arith.constant dense<0.000000e+00> : vector<1x8x8xf32>
    %46 = tpu.matmul %45, %34, %cst_18 {dimension_numbers = #tpu.dot_dimension_numbers<[2], [1], [1], [2], [0, 0, 0, 1, 1, 2], [0], [0]>} : vector<1x8x8xf32>, vector<1x8x8xf32>, vector<1x8x8xf32> -> vector<1x8x8xf32>
    "tpu.trace_stop"() : () -> ()
    %c0_19 = arith.constant 0 : index
    %c0_20 = arith.constant 0 : index
    %c0_21 = arith.constant 0 : index
    %47 = vector.load %arg15[%c0_19, %c0_20, %c0_21] : memref<1x8x32xf32, #tpu.memory_space<vmem>>, vector<1x8x8xf32>
    tpu.vector_store %arg15[%c0_19, %c0_20, %c0_21], %46 {strides = array<i32>} : memref<1x8x32xf32, #tpu.memory_space<vmem>>, vector<1x8x8xf32>,
    %48 = vector.extract_strided_slice %31 {offsets = [0, 0, 8], sizes = [1, 8, 8], strides = [1, 1, 1]} : vector<1x8x96xf32> to vector<1x8x8xf32>
    %49 = vector.extract_strided_slice %31 {offsets = [0, 0, 40], sizes = [1, 8, 8], strides = [1, 1, 1]} : vector<1x8x96xf32> to vector<1x8x8xf32>
    %50 = vector.extract_strided_slice %31 {offsets = [0, 0, 72], sizes = [1, 8, 8], strides = [1, 1, 1]} : vector<1x8x96xf32> to vector<1x8x8xf32>
    "tpu.trace_start"() <{level = 10 : i32, message = "bqd,bkd->bqk"}> : () -> ()
    %cst_22 = arith.constant dense<0.000000e+00> : vector<1x8x8xf32>
    %51 = tpu.matmul %48, %49, %cst_22 {dimension_numbers = #tpu.dot_dimension_numbers<[2], [2], [1], [1], [0, 0, 0, 1, 1, 1], [0], [0]>} : vector<1x8x8xf32>, vector<1x8x8xf32>, vector<1x8x8xf32> -> vector<1x8x8xf32>
    "tpu.trace_stop"() : () -> ()
    %cst_23 = arith.constant dense<0xFF800000> : vector<1x8xf32>
    %52 = vector.multi_reduction <maximumf>, %51, %cst_23 [2] : vector<1x8x8xf32> to vector<1x8xf32>
    %53 = vector.shape_cast %52 : vector<1x8xf32> to vector<1x8x1xf32>
    %54 = vector.broadcast %53 : vector<1x8x1xf32> to vector<1x8x8xf32>
    %55 = arith.subf %51, %54 : vector<1x8x8xf32>
    %56 = math.exp %55 : vector<1x8x8xf32>
    %cst_24 = arith.constant dense<0.000000e+00> : vector<1x8xf32>
    %57 = vector.multi_reduction <add>, %56, %cst_24 [2] : vector<1x8x8xf32> to vector<1x8xf32>
    %58 = vector.shape_cast %57 : vector<1x8xf32> to vector<1x8x1xf32>
    %59 = tpu.reciprocal %58 {approx = true} : vector<1x8x1xf32> -> vector<1x8x1xf32>
    %60 = vector.broadcast %59 : vector<1x8x1xf32> to vector<1x8x8xf32>
    %61 = arith.mulf %56, %60 : vector<1x8x8xf32>
    "tpu.trace_start"() <{level = 10 : i32, message = "bqk,bkd->bqd"}> : () -> ()
    %cst_25 = arith.constant dense<0.000000e+00> : vector<1x8x8xf32>
    %62 = tpu.matmul %61, %50, %cst_25 {dimension_numbers = #tpu.dot_dimension_numbers<[2], [1], [1], [2], [0, 0, 0, 1, 1, 2], [0], [0]>} : vector<1x8x8xf32>, vector<1x8x8xf32>, vector<1x8x8xf32> -> vector<1x8x8xf32>
    "tpu.trace_stop"() : () -> ()
    %c0_26 = arith.constant 0 : index
    %c0_27 = arith.constant 0 : index
    %c8 = arith.constant 8 : index
    %63 = vector.load %arg15[%c0_26, %c0_27, %c8] : memref<1x8x32xf32, #tpu.memory_space<vmem>>, vector<1x8x8xf32>
    tpu.vector_store %arg15[%c0_26, %c0_27, %c8], %62 {strides = array<i32>} : memref<1x8x32xf32, #tpu.memory_space<vmem>>, vector<1x8x8xf32>,
    %64 = vector.extract_strided_slice %31 {offsets = [0, 0, 16], sizes = [1, 8, 8], strides = [1, 1, 1]} : vector<1x8x96xf32> to vector<1x8x8xf32>
    %65 = vector.extract_strided_slice %31 {offsets = [0, 0, 48], sizes = [1, 8, 8], strides = [1, 1, 1]} : vector<1x8x96xf32> to vector<1x8x8xf32>
    %66 = vector.extract_strided_slice %31 {offsets = [0, 0, 80], sizes = [1, 8, 8], strides = [1, 1, 1]} : vector<1x8x96xf32> to vector<1x8x8xf32>
    "tpu.trace_start"() <{level = 10 : i32, message = "bqd,bkd->bqk"}> : () -> ()
    %cst_28 = arith.constant dense<0.000000e+00> : vector<1x8x8xf32>
    %67 = tpu.matmul %64, %65, %cst_28 {dimension_numbers = #tpu.dot_dimension_numbers<[2], [2], [1], [1], [0, 0, 0, 1, 1, 1], [0], [0]>} : vector<1x8x8xf32>, vector<1x8x8xf32>, vector<1x8x8xf32> -> vector<1x8x8xf32>
    "tpu.trace_stop"() : () -> ()
    %cst_29 = arith.constant dense<0xFF800000> : vector<1x8xf32>
    %68 = vector.multi_reduction <maximumf>, %67, %cst_29 [2] : vector<1x8x8xf32> to vector<1x8xf32>
    %69 = vector.shape_cast %68 : vector<1x8xf32> to vector<1x8x1xf32>
    %70 = vector.broadcast %69 : vector<1x8x1xf32> to vector<1x8x8xf32>
    %71 = arith.subf %67, %70 : vector<1x8x8xf32>
    %72 = math.exp %71 : vector<1x8x8xf32>
    %cst_30 = arith.constant dense<0.000000e+00> : vector<1x8xf32>
    %73 = vector.multi_reduction <add>, %72, %cst_30 [2] : vector<1x8x8xf32> to vector<1x8xf32>
    %74 = vector.shape_cast %73 : vector<1x8xf32> to vector<1x8x1xf32>
    %75 = tpu.reciprocal %74 {approx = true} : vector<1x8x1xf32> -> vector<1x8x1xf32>
    %76 = vector.broadcast %75 : vector<1x8x1xf32> to vector<1x8x8xf32>
    %77 = arith.mulf %72, %76 : vector<1x8x8xf32>
    "tpu.trace_start"() <{level = 10 : i32, message = "bqk,bkd->bqd"}> : () -> ()
    %cst_31 = arith.constant dense<0.000000e+00> : vector<1x8x8xf32>
    %78 = tpu.matmul %77, %66, %cst_31 {dimension_numbers = #tpu.dot_dimension_numbers<[2], [1], [1], [2], [0, 0, 0, 1, 1, 2], [0], [0]>} : vector<1x8x8xf32>, vector<1x8x8xf32>, vector<1x8x8xf32> -> vector<1x8x8xf32>
    "tpu.trace_stop"() : () -> ()
    %c0_32 = arith.constant 0 : index
    %c0_33 = arith.constant 0 : index
    %c16 = arith.constant 16 : index
    %79 = vector.load %arg15[%c0_32, %c0_33, %c16] : memref<1x8x32xf32, #tpu.memory_space<vmem>>, vector<1x8x8xf32>
    tpu.vector_store %arg15[%c0_32, %c0_33, %c16], %78 {strides = array<i32>} : memref<1x8x32xf32, #tpu.memory_space<vmem>>, vector<1x8x8xf32>,
    %80 = vector.extract_strided_slice %31 {offsets = [0, 0, 24], sizes = [1, 8, 8], strides = [1, 1, 1]} : vector<1x8x96xf32> to vector<1x8x8xf32>
    %81 = vector.extract_strided_slice %31 {offsets = [0, 0, 56], sizes = [1, 8, 8], strides = [1, 1, 1]} : vector<1x8x96xf32> to vector<1x8x8xf32>
    %82 = vector.extract_strided_slice %31 {offsets = [0, 0, 88], sizes = [1, 8, 8], strides = [1, 1, 1]} : vector<1x8x96xf32> to vector<1x8x8xf32>
    "tpu.trace_start"() <{level = 10 : i32, message = "bqd,bkd->bqk"}> : () -> ()
    %cst_34 = arith.constant dense<0.000000e+00> : vector<1x8x8xf32>
    %83 = tpu.matmul %80, %81, %cst_34 {dimension_numbers = #tpu.dot_dimension_numbers<[2], [2], [1], [1], [0, 0, 0, 1, 1, 1], [0], [0]>} : vector<1x8x8xf32>, vector<1x8x8xf32>, vector<1x8x8xf32> -> vector<1x8x8xf32>
    "tpu.trace_stop"() : () -> ()
    %cst_35 = arith.constant dense<0xFF800000> : vector<1x8xf32>
    %84 = vector.multi_reduction <maximumf>, %83, %cst_35 [2] : vector<1x8x8xf32> to vector<1x8xf32>
    %85 = vector.shape_cast %84 : vector<1x8xf32> to vector<1x8x1xf32>
    %86 = vector.broadcast %85 : vector<1x8x1xf32> to vector<1x8x8xf32>
    %87 = arith.subf %83, %86 : vector<1x8x8xf32>
    %88 = math.exp %87 : vector<1x8x8xf32>
    %cst_36 = arith.constant dense<0.000000e+00> : vector<1x8xf32>
    %89 = vector.multi_reduction <add>, %88, %cst_36 [2] : vector<1x8x8xf32> to vector<1x8xf32>
    %90 = vector.shape_cast %89 : vector<1x8xf32> to vector<1x8x1xf32>
    %91 = tpu.reciprocal %90 {approx = true} : vector<1x8x1xf32> -> vector<1x8x1xf32>
    %92 = vector.broadcast %91 : vector<1x8x1xf32> to vector<1x8x8xf32>
    %93 = arith.mulf %88, %92 : vector<1x8x8xf32>
    "tpu.trace_start"() <{level = 10 : i32, message = "bqk,bkd->bqd"}> : () -> ()
    %cst_37 = arith.constant dense<0.000000e+00> : vector<1x8x8xf32>
    %94 = tpu.matmul %93, %82, %cst_37 {dimension_numbers = #tpu.dot_dimension_numbers<[2], [1], [1], [2], [0, 0, 0, 1, 1, 2], [0], [0]>} : vector<1x8x8xf32>, vector<1x8x8xf32>, vector<1x8x8xf32> -> vector<1x8x8xf32>
    "tpu.trace_stop"() : () -> ()
    %c0_38 = arith.constant 0 : index
    %c0_39 = arith.constant 0 : index
    %c24 = arith.constant 24 : index
    %95 = vector.load %arg15[%c0_38, %c0_39, %c24] : memref<1x8x32xf32, #tpu.memory_space<vmem>>, vector<1x8x8xf32>
    tpu.vector_store %arg15[%c0_38, %c0_39, %c24], %94 {strides = array<i32>} : memref<1x8x32xf32, #tpu.memory_space<vmem>>, vector<1x8x8xf32>,
    %c0_40 = arith.constant 0 : index
    %c0_41 = arith.constant 0 : index
    %c0_42 = arith.constant 0 : index
    %96 = vector.load %arg15[%c0_40, %c0_41, %c0_42] : memref<1x8x32xf32, #tpu.memory_space<vmem>>, vector<1x8x32xf32>
    %97 = vector.shape_cast %96 : vector<1x8x32xf32> to vector<8x32xf32>
    %c0_43 = arith.constant 0 : index
    %c0_44 = arith.constant 0 : index
    %98 = vector.load %arg6[%c0_43, %c0_44] : memref<32x32xf32, #tpu.memory_space<vmem>>, vector<32x32xf32>
    %cst_45 = arith.constant dense<0.000000e+00> : vector<8x32xf32>
    %99 = tpu.matmul %97, %98, %cst_45 {dimension_numbers = #tpu.dot_dimension_numbers<[1], [0], [0], [1], [0, 0, 1, 1], [], []>} : vector<8x32xf32>, vector<32x32xf32>, vector<8x32xf32> -> vector<8x32xf32>
    %100 = arith.addf %1, %99 : vector<8x32xf32>
    %c0_46 = arith.constant 0 : index
    %c0_47 = arith.constant 0 : index
    %101 = vector.load %arg7[%c0_46, %c0_47] : memref<1x32xf32, #tpu.memory_space<vmem>>, vector<1x32xf32>
    %102 = vector.broadcast %101 : vector<1x32xf32> to vector<8x32xf32>
    %103 = arith.addf %100, %102 : vector<8x32xf32>
    %c0_48 = arith.constant 0 : index
    %c0_49 = arith.constant 0 : index
    %104 = vector.load %arg8[%c0_48, %c0_49] : memref<1x32xf32, #tpu.memory_space<vmem>>, vector<1x32xf32>
    %c0_50 = arith.constant 0 : index
    %c0_51 = arith.constant 0 : index
    %105 = vector.load %arg9[%c0_50, %c0_51] : memref<1x32xf32, #tpu.memory_space<vmem>>, vector<1x32xf32>
    %cst_52 = arith.constant dense<0.000000e+00> : vector<8xf32>
    %106 = vector.multi_reduction <add>, %103, %cst_52 [1] : vector<8x32xf32> to vector<8xf32>
    %107 = vector.shape_cast %106 : vector<8xf32> to vector<8x1xf32>
    %cst_53 = arith.constant 3.200000e+01 : f32
    %108 = vector.broadcast %cst_53 : f32 to vector<8x1xf32>
    %109 = arith.divf %107, %108 : vector<8x1xf32>
    %110 = vector.broadcast %109 : vector<8x1xf32> to vector<8x32xf32>
    %111 = arith.subf %103, %110 : vector<8x32xf32>
    %112 = arith.mulf %111, %111 : vector<8x32xf32>
    %cst_54 = arith.constant dense<0.000000e+00> : vector<8xf32>
    %113 = vector.multi_reduction <add>, %112, %cst_54 [1] : vector<8x32xf32> to vector<8xf32>
    %114 = vector.shape_cast %113 : vector<8xf32> to vector<8x1xf32>
    %cst_55 = arith.constant 3.200000e+01 : f32
    %115 = vector.broadcast %cst_55 : f32 to vector<8x1xf32>
    %116 = arith.divf %114, %115 : vector<8x1xf32>
    %117 = vector.broadcast %109 : vector<8x1xf32> to vector<8x32xf32>
    %118 = arith.subf %103, %117 : vector<8x32xf32>
    %cst_56 = arith.constant 9.99999996E-13 : f32
    %119 = vector.broadcast %cst_56 : f32 to vector<8x1xf32>
    %120 = arith.addf %116, %119 : vector<8x1xf32>
    %121 = math.rsqrt %120 : vector<8x1xf32>
    %122 = vector.broadcast %121 : vector<8x1xf32> to vector<8x32xf32>
    %123 = arith.mulf %118, %122 : vector<8x32xf32>
    %124 = vector.broadcast %104 : vector<1x32xf32> to vector<8x32xf32>
    %125 = arith.mulf %124, %123 : vector<8x32xf32>
    %126 = vector.broadcast %105 : vector<1x32xf32> to vector<8x32xf32>
    %127 = arith.addf %125, %126 : vector<8x32xf32>
    %c0_57 = arith.constant 0 : index
    %c0_58 = arith.constant 0 : index
    %128 = vector.load %arg10[%c0_57, %c0_58] : memref<32x128xf32, #tpu.memory_space<vmem>>, vector<32x128xf32>
    %cst_59 = arith.constant dense<0.000000e+00> : vector<8x128xf32>
    %129 = tpu.matmul %127, %128, %cst_59 {dimension_numbers = #tpu.dot_dimension_numbers<[1], [0], [0], [1], [0, 0, 1, 1], [], []>} : vector<8x32xf32>, vector<32x128xf32>, vector<8x128xf32> -> vector<8x128xf32>
    %c0_60 = arith.constant 0 : index
    %c0_61 = arith.constant 0 : index
    %130 = vector.load %arg11[%c0_60, %c0_61] : memref<1x128xf32, #tpu.memory_space<vmem>>, vector<1x128xf32>
    %131 = vector.broadcast %130 : vector<1x128xf32> to vector<8x128xf32>
    %132 = arith.addf %129, %131 : vector<8x128xf32>
    %cst_62 = arith.constant 1.702000e+00 : f32
    %133 = vector.broadcast %cst_62 : f32 to vector<8x128xf32>
    %134 = arith.mulf %133, %132 : vector<8x128xf32>
    %135 = arith.negf %134 : vector<8x128xf32>
    %136 = math.exp %135 : vector<8x128xf32>
    %cst_63 = arith.constant 1.000000e+00 : f32
    %137 = vector.broadcast %cst_63 : f32 to vector<8x128xf32>
    %138 = arith.addf %137, %136 : vector<8x128xf32>
    %139 = arith.divf %137, %138 : vector<8x128xf32>
    %140 = arith.mulf %132, %139 : vector<8x128xf32>
    %c0_64 = arith.constant 0 : index
    %c0_65 = arith.constant 0 : index
    %141 = vector.load %arg12[%c0_64, %c0_65] : memref<128x32xf32, #tpu.memory_space<vmem>>, vector<128x32xf32>
    %cst_66 = arith.constant dense<0.000000e+00> : vector<8x32xf32>
    %142 = tpu.matmul %140, %141, %cst_66 {dimension_numbers = #tpu.dot_dimension_numbers<[1], [0], [0], [1], [0, 0, 1, 1], [], []>} : vector<8x128xf32>, vector<128x32xf32>, vector<8x32xf32> -> vector<8x32xf32>
    %143 = arith.addf %103, %142 : vector<8x32xf32>
    %c0_67 = arith.constant 0 : index
    %c0_68 = arith.constant 0 : index
    %144 = vector.load %arg13[%c0_67, %c0_68] : memref<1x32xf32, #tpu.memory_space<vmem>>, vector<1x32xf32>
    %145 = vector.broadcast %144 : vector<1x32xf32> to vector<8x32xf32>
    %146 = arith.addf %143, %145 : vector<8x32xf32>
    %147 = vector.shape_cast %146 : vector<8x32xf32> to vector<1x8x32xf32>
    %c0_69 = arith.constant 0 : index
    %c0_70 = arith.constant 0 : index
    %c0_71 = arith.constant 0 : index
    %148 = vector.load %arg14[%c0_69, %c0_70, %c0_71] : memref<1x8x32xf32, #tpu.memory_space<vmem>>, vector<1x8x32xf32>
    tpu.vector_store %arg14[%c0_69, %c0_70, %c0_71], %147 {strides = array<i32>} : memref<1x8x32xf32, #tpu.memory_space<vmem>>, vector<1x8x32xf32>,
    return
  }
  func.func @transform_0(%arg0: i32) -> (i32, i32, i32) {
    %c0_i32 = arith.constant 0 : i32
    %c0_i32_0 = arith.constant 0 : i32
    %c0_i32_1 = arith.constant 0 : i32
    return %arg0, %c0_i32, %c0_i32_0 : i32, i32, i32
  }
  func.func @transform_1(%arg0: i32) -> (i32, i32) {
    %c0_i32 = arith.constant 0 : i32
    %c0_i32_0 = arith.constant 0 : i32
    %c0_i32_1 = arith.constant 0 : i32
    return %c0_i32, %c0_i32_0 : i32, i32
  }
  func.func @transform_2(%arg0: i32) -> (i32, i32) {
    %c0_i32 = arith.constant 0 : i32
    %c0_i32_0 = arith.constant 0 : i32
    %c0_i32_1 = arith.constant 0 : i32
    return %c0_i32, %c0_i32_0 : i32, i32
  }
  func.func @transform_3(%arg0: i32) -> (i32, i32) {
    %c0_i32 = arith.constant 0 : i32
    %c0_i32_0 = arith.constant 0 : i32
    %c0_i32_1 = arith.constant 0 : i32
    return %c0_i32, %c0_i32_0 : i32, i32
  }
  func.func @transform_4(%arg0: i32) -> (i32, i32) {
    %c0_i32 = arith.constant 0 : i32
    %c0_i32_0 = arith.constant 0 : i32
    %c0_i32_1 = arith.constant 0 : i32
    return %c0_i32, %c0_i32_0 : i32, i32
  }
  func.func @transform_5(%arg0: i32) -> (i32, i32) {
    %c0_i32 = arith.constant 0 : i32
    %c0_i32_0 = arith.constant 0 : i32
    %c0_i32_1 = arith.constant 0 : i32
    return %c0_i32, %c0_i32_0 : i32, i32
  }
  func.func @transform_6(%arg0: i32) -> (i32, i32) {
    %c0_i32 = arith.constant 0 : i32
    %c0_i32_0 = arith.constant 0 : i32
    %c0_i32_1 = arith.constant 0 : i32
    return %c0_i32, %c0_i32_0 : i32, i32
  }
  func.func @transform_7(%arg0: i32) -> (i32, i32) {
    %c0_i32 = arith.constant 0 : i32
    %c0_i32_0 = arith.constant 0 : i32
    %c0_i32_1 = arith.constant 0 : i32
    return %c0_i32, %c0_i32_0 : i32, i32
  }
  func.func @transform_8(%arg0: i32) -> (i32, i32) {
    %c0_i32 = arith.constant 0 : i32
    %c0_i32_0 = arith.constant 0 : i32
    %c0_i32_1 = arith.constant 0 : i32
    return %c0_i32, %c0_i32_0 : i32, i32
  }
  func.func @transform_9(%arg0: i32) -> (i32, i32) {
    %c0_i32 = arith.constant 0 : i32
    %c0_i32_0 = arith.constant 0 : i32
    %c0_i32_1 = arith.constant 0 : i32
    return %c0_i32, %c0_i32_0 : i32, i32
  }
  func.func @transform_10(%arg0: i32) -> (i32, i32) {
    %c0_i32 = arith.constant 0 : i32
    %c0_i32_0 = arith.constant 0 : i32
    %c0_i32_1 = arith.constant 0 : i32
    return %c0_i32, %c0_i32_0 : i32, i32
  }
  func.func @transform_11(%arg0: i32) -> (i32, i32) {
    %c0_i32 = arith.constant 0 : i32
    %c0_i32_0 = arith.constant 0 : i32
    %c0_i32_1 = arith.constant 0 : i32
    return %c0_i32, %c0_i32_0 : i32, i32
  }
  func.func @transform_12(%arg0: i32) -> (i32, i32) {
    %c0_i32 = arith.constant 0 : i32
    %c0_i32_0 = arith.constant 0 : i32
    %c0_i32_1 = arith.constant 0 : i32
    return %c0_i32, %c0_i32_0 : i32, i32
  }
  func.func @transform_13(%arg0: i32) -> (i32, i32, i32) {
    %c0_i32 = arith.constant 0 : i32
    %c0_i32_0 = arith.constant 0 : i32
    %c0_i32_1 = arith.constant 0 : i32
    return %arg0, %c0_i32, %c0_i32_0 : i32, i32, i32
  }
}

</mosaic_0001>

<bundles_post_ra>
// kernel: _forward.2
= control target key start
LH: loop header
LB: loop body
LE: loop exit
PB: predicated region body
PF: predicated region fallthrough
CT: control target
= control target key end

     0   :  { %s3496_s0 = inlined_call_operand.hbm [shape: f32[2,8,32], index: 0, kind: input, shape index: {}, may-alias: {0,13}]   ;;  %s3497_s1 = inlined_call_operand.hbm [shape: f32[1,32], index: 1, kind: input, shape index: {}]   ;;  %s3498_s2 = inlined_call_operand.hbm [shape: f32[1,32], index: 2, kind: input, shape index: {}]   ;;  %s3499_s3 = inlined_call_operand.hbm [shape: f32[32,96], index: 3, kind: input, shape index: {}]   ;;  %s3500_s4 = inlined_call_operand.hbm [shape: f32[1,96], index: 4, kind: input, shape index: {}]   ;;  %s3501_s5 = inlined_call_operand.hbm [shape: f32[32,32], index: 5, kind: input, shape index: {}]   ;;  %s3502_s6 = inlined_call_operand.hbm [shape: f32[1,32], index: 6, kind: input, shape index: {}]   ;;  %s3503_s7 = inlined_call_operand.hbm [shape: f32[1,32], index: 7, kind: input, shape index: {}]   ;;  %s3504_s8 = inlined_call_operand.hbm [shape: f32[1,32], index: 8, kind: input, shape index: {}]   ;;  %s3505_s9 = inlined_call_operand.hbm [shape: f32[32,128], index: 9, kind: input, shape index: {}]   ;;  %s3506_s10 = inlined_call_operand.hbm [shape: f32[1,128], index: 10, kind: input, shape index: {}]   ;;  %s3507_s11 = inlined_call_operand.hbm [shape: f32[128,32], index: 11, kind: input, shape index: {}]   ;;  %s3508_s12 = inlined_call_operand.hbm [shape: f32[1,32], index: 12, kind: input, shape index: {}]   ;;  %s3509_s13 = inlined_call_operand.hbm [shape: f32[2,8,32], index: 13, kind: output, shape index: {}, may-alias: {0,13}]  }
   0x1   :  { %3519 = sst [smem:[#allocation35_spill]] %s3496_s0 }
   0x2   :  { %3520 = sst [smem:[#allocation36_spill]] %s3497_s1 }
   0x3   :  { %3521 = sst [smem:[#allocation37_spill]] %s3498_s2 }
   0x4   :  { %3522 = sst [smem:[#allocation38_spill]] %s3499_s3 }
   0x5   :  { %3523 = sst [smem:[#allocation39_spill]] %s3509_s13 }
   0x6   :  { %18 = vsyncpa [#allocation4], 0 }
   0x7   :  { %20 = vsyncpa [#allocation4 + $0x1], 0 }
   0x8   :  { %21 = vsyncpa [#allocation7], 0 }
   0x9   :  { %22 = vsyncpa [#allocation10], 0 }
   0xa   :  { %23 = vsyncpa [#allocation13], 0 }
   0xb   :  { %24 = vsyncpa [#allocation16], 0 }
   0xc   :  { %25 = vsyncpa [#allocation19], 0 }
   0xd   :  { %26 = vsyncpa [#allocation22], 0 }
   0xe   :  { %27 = vsyncpa [#allocation5], 0 }
   0xf   :  { %29 = vsyncpa [#allocation5 + $0x1], 0  ;;  %s2940_s25 = smov 0   ;;  %s2942_s26 = smov 0  }
  0x10   :  { %s2944_s27 = smov 0   ;;  %s2946_s28 = smov 0  }
  0x11 LB: > { %s2837_s29 = smov [#allocation6]   ;;  %s2961_s14 = sadd.s32 4294967295, %s2835_s28   ;;  %s2835_s28 = sphi %s2946_s28, %s3562_s28   ;;  %s2831_s27 = sphi %s2944_s27, %s3561_s27   ;;  %s2827_s26 = sphi %s2942_s26, %s3560_s26   ;;  %s2823_s25 = sphi %s2940_s25, %s3559_s25  }
  0x12   : > { %s357_s30 = sshll.u32 %s2837_s29, 4  ;;  %3524 = sst [smem:[#allocation33_spill]] %s2961_s14  ;;  %s2966_s30 = int_to_ptr.vmem [resolvable:$true] %s357_s30 }
  0x13   : > { %p1912_p0 = scmp.ge.s32.totalorder %s2835_s28, 1  ;;  %p3516_p1 = scmp.eq.s32.totalorder %s2961_s14, 0 }
  0x14   : > { %p344_p2 = scmp.lt.s32.totalorder %s2835_s28, 3  ;;  %s2838_s16 = smov [#allocation9]  }
  0x15   : > { %s378_s17 = sshll.u32 %s2838_s16, 4  ;;  %s2839_s19 = smov [#allocation12]   ;;  %s2975_s17 = int_to_ptr.vmem [resolvable:$true] %s378_s17 }
  0x16   : > { %p2968_p3 = pnand %p1912_p0, %p344_p2  ;;  %s402_s20 = sshll.u32 %s2839_s19, 4  ;;  %s2983_s20 = int_to_ptr.vmem [resolvable:$true] %s402_s20 }
  0x17   : > { %s3528_s1 = sld [smem:[#allocation36_spill]] }
  0x18   : > { %s3525_s15 = scalar_select %p2968_p3, 1, 0 }
  0x19   : > { %p2221_p5 = pneg %p2968_p3 }
  0x1a   : > { %3526 = sst [smem:[#allocation34_spill]] %s3525_s15 }
  0x1b   : > { %p2979_p6 = pnand %p2221_p5, %p3516_p1 }
  0x1d   : > { %s2379_s23 = scalar_lea.hbm %s3528_s1, 16  ;;  %p2993_p8 = pneg %p2979_p6 }
  0x1e   : > { %p2380_p7 = scmp.ne.s32.totalorder %s3528_s1, %s2379_s23  ;;  %p2386_p11 = scmp.lt.u32.totalorder %s2379_s23, %s3528_s1 }
  0x20   : > { %p2382_p9 = pnand %p2993_p8, %p2380_p7 }
  0x22   : > { %p2383_p10 = pneg %p2382_p9 }
  0x24   : > { %p2388_p12 = pnand %p2386_p11, %p2383_p10 }
  0x26   : > { %2391 = shalt.err (!%p2388_p12)
}
  0x27   : > { %s2392_s21 = scalar_lea.vmem %s2966_s30, 16  ;;  %s2399_s22 = scalar_lea.vmem %s2966_s30, 32 }
  0x28   : > { %p2393_p13 = scmp.ne.s32.totalorder %s2966_s30, %s2392_s21  ;;  %p2400_p5 = scmp.lt.s32.totalorder %s2966_s30, %s2966_s30 }
  0x29   : > { %p2401_p7 = scmp.lt.s32.totalorder %s2399_s22, %s2392_s21 }
  0x2a   : > { %p2395_p0 = pnand %p2393_p13, %p2993_p8 }
  0x2b   : > { %p2402_p9 = por %p2401_p7, %p2400_p5 }
  0x2c   : > { %p2396_p2 = pneg %p2395_p0 }
  0x2e   : > { %p2403_p4 = pnand %p2402_p9, %p2396_p2 }
  0x30   : > { %2406 = shalt.err (!%p2403_p4)
}
  0x31   : > { %2224 = dma.hbm_to_vmem [thread:$0]  (!%p2979_p6), %s3528_s1, 16, %s2966_s30, [#allocation7]  }
  0x32   : > { %s3530_s3 = sld [smem:[#allocation38_spill]] }
  0x38   : > { %s2407_s19 = scalar_lea.hbm %s3530_s3, 512 }
  0x39   : > { %p2408_p10 = scmp.ne.s32.totalorder %s3530_s3, %s2407_s19  ;;  %p2414_p4 = scmp.lt.u32.totalorder %s2407_s19, %s3530_s3 }
  0x3b   : > { %p2410_p11 = pnand %p2408_p10, %p2993_p8 }
  0x3d   : > { %p2411_p12 = pneg %p2410_p11 }
  0x3f   : > { %p2416_p13 = pnand %p2414_p4, %p2411_p12 }
  0x41   : > { %2419 = shalt.err (!%p2416_p13)
}
  0x42   : > { %s2420_s30 = scalar_lea.vmem %s2975_s17, 512  ;;  %p2428_p7 = scmp.lt.s32.totalorder %s2975_s17, %s2975_s17 }
  0x43   : > { %p2421_p0 = scmp.ne.s32.totalorder %s2975_s17, %s2420_s30  ;;  %p2429_p9 = scmp.lt.s32.totalorder %s2420_s30, %s2420_s30 }
  0x45   : > { %p2423_p2 = pnand %p2421_p0, %p2993_p8  ;;  %p2430_p10 = por %p2429_p9, %p2428_p7 }
  0x47   : > { %p2424_p5 = pneg %p2423_p2 }
  0x49   : > { %p2431_p11 = pnand %p2430_p10, %p2424_p5 }
  0x4b   : > { %2434 = shalt.err (!%p2431_p11)
}
  0x4c   : > { %s2840_s0 = smov 128   ;;  %s2841_s15 = smov 8  }
  0x4d   : > { %2230 = dma.hbm_to_vmem [thread:$0]  (!%p2979_p6), %s3530_s3, 512, %s2975_s17, [#allocation10], %s2840_s0, %s2840_s0, %s2841_s15  }
  0x4e   : > { %s2435_s19 = scalar_lea.hbm %s3501_s5, 512 }
  0x4f   : > { %p2436_p12 = scmp.ne.s32.totalorder %s3501_s5, %s2435_s19  ;;  %p2442_p0 = scmp.lt.u32.totalorder %s2435_s19, %s3501_s5 }
  0x51   : > { %p2438_p4 = pnand %p2436_p12, %p2993_p8 }
  0x53   : > { %p2439_p13 = pneg %p2438_p4 }
  0x55   : > { %p2444_p2 = pnand %p2442_p0, %p2439_p13 }
  0x57   : > { %2447 = shalt.err (!%p2444_p2)
}
  0x58   : > { %s2448_s17 = scalar_lea.vmem %s2983_s20, 512  ;;  %p2456_p10 = scmp.lt.s32.totalorder %s2983_s20, %s2983_s20 }
  0x59   : > { %p2449_p5 = scmp.ne.s32.totalorder %s2983_s20, %s2448_s17  ;;  %p2457_p11 = scmp.lt.s32.totalorder %s2448_s17, %s2448_s17 }
  0x5b   : > { %p2451_p7 = pnand %p2449_p5, %p2993_p8  ;;  %p2458_p12 = por %p2457_p11, %p2456_p10 }
  0x5d   : > { %p2452_p9 = pneg %p2451_p7 }
  0x5f   : > { %p2459_p4 = pnand %p2458_p12, %p2452_p9 }
  0x61   : > { %2462 = shalt.err (!%p2459_p4)
}
  0x62   : > { %2236 = dma.hbm_to_vmem [thread:$0]  (!%p2979_p6), %s3501_s5, 512, %s2983_s20, [#allocation13], %s2840_s0, %s2840_s0, %s2841_s15  }
  0x63   : > { %s2842_s23 = smov [#allocation15]   ;;  %s2843_s29 = smov [#allocation18]  }
  0x64   : > { %s427_s24 = sshll.u32 %s2842_s23, 4  ;;  %s448_s19 = sshll.u32 %s2843_s29, 4  ;;  %s428_s24 = int_to_ptr.vmem [resolvable:$true] %s427_s24  ;;  %s449_s19 = int_to_ptr.vmem [resolvable:$true] %s448_s19 }
  0x65   : > { %s2463_s30 = scalar_lea.hbm %s3503_s7, 16 }
  0x66   : > { %p2464_p13 = scmp.ne.s32.totalorder %s3503_s7, %s2463_s30  ;;  %p2470_p5 = scmp.lt.u32.totalorder %s2463_s30, %s3503_s7 }
  0x68   : > { %p2466_p0 = pnand %p2464_p13, %p2993_p8 }
  0x6a   : > { %p2467_p2 = pneg %p2466_p0 }
  0x6c   : > { %p2472_p7 = pnand %p2470_p5, %p2467_p2 }
  0x6e   : > { %2475 = shalt.err (!%p2472_p7)
}
  0x6f   : > { %s2476_s20 = scalar_lea.vmem %s428_s24, 16  ;;  %s2483_s13 = scalar_lea.vmem %s428_s24, 32 }
  0x70   : > { %p2477_p9 = scmp.ne.s32.totalorder %s428_s24, %s2476_s20  ;;  %p2484_p12 = scmp.lt.s32.totalorder %s428_s24, %s428_s24 }
  0x71   : > { %p2485_p4 = scmp.lt.s32.totalorder %s2483_s13, %s2476_s20 }
  0x72   : > { %p2479_p10 = pnand %p2477_p9, %p2993_p8 }
  0x73   : > { %p2486_p1 = por %p2485_p4, %p2484_p12 }
  0x74   : > { %p2480_p11 = pneg %p2479_p10 }
  0x76   : > { %p2487_p3 = pnand %p2486_p1, %p2480_p11 }
  0x78   : > { %2490 = shalt.err (!%p2487_p3)
}
  0x79   : > { %2242 = dma.hbm_to_vmem [thread:$0]  (!%p2979_p6), %s3503_s7, 16, %s428_s24, [#allocation16]  }
  0x7a   : > { %s2491_s21 = scalar_lea.hbm %s3505_s9, 512 }
  0x7b   : > { %p2492_p13 = scmp.ne.s32.totalorder %s3505_s9, %s2491_s21  ;;  %p2498_p3 = scmp.lt.u32.totalorder %s2491_s21, %s3505_s9 }
  0x7d   : > { %p2494_p0 = pnand %p2492_p13, %p2993_p8 }
  0x7f   : > { %p2495_p1 = pneg %p2494_p0 }
  0x81   : > { %p2500_p2 = pnand %p2498_p3, %p2495_p1 }
  0x83   : > { %2503 = shalt.err (!%p2500_p2)
}
  0x84   : > { %s2504_s20 = scalar_lea.vmem %s449_s19, 512  ;;  %p2512_p10 = scmp.lt.s32.totalorder %s449_s19, %s449_s19 }
  0x85   : > { %p2505_p5 = scmp.ne.s32.totalorder %s449_s19, %s2504_s20  ;;  %p2513_p11 = scmp.lt.s32.totalorder %s2504_s20, %s2504_s20 }
  0x87   : > { %p2507_p7 = pnand %p2505_p5, %p2993_p8  ;;  %p2514_p12 = por %p2513_p11, %p2512_p10 }
  0x89   : > { %p2508_p9 = pneg %p2507_p7 }
  0x8b   : > { %p2515_p4 = pnand %p2514_p12, %p2508_p9 }
  0x8d   : > { %2518 = shalt.err (!%p2515_p4)
}
  0x8e   : > { %2248 = dma.hbm_to_vmem [thread:$0]  (!%p2979_p6), %s3505_s9, 512, %s449_s19, [#allocation19], %s2840_s0, %s2840_s0, %s2841_s15  }
  0x8f   : > { %s2844_s3 = smov [#allocation21]   ;;  %s2845_s14 = smov [#allocation8]  }
  0x90   : > { %s472_s23 = sshll.u32 %s2844_s3, 4  ;;  %s368_s29 = sshll.u32 %s2845_s14, 4  ;;  %s473_s23 = int_to_ptr.vmem [resolvable:$true] %s472_s23  ;;  %s369_s29 = int_to_ptr.vmem [resolvable:$true] %s368_s29 }
  0x91   : > { %s2519_s30 = scalar_lea.hbm %s3507_s11, 2048 }
  0x92   : > { %p2520_p13 = scmp.ne.s32.totalorder %s3507_s11, %s2519_s30  ;;  %p2526_p3 = scmp.lt.u32.totalorder %s2519_s30, %s3507_s11 }
  0x94   : > { %p2522_p0 = pnand %p2520_p13, %p2993_p8 }
  0x96   : > { %p2523_p1 = pneg %p2522_p0 }
  0x98   : > { %p2528_p2 = pnand %p2526_p3, %p2523_p1 }
  0x9a   : > { %2531 = shalt.err (!%p2528_p2)
}
  0x9b   : > { %s2532_s19 = scalar_lea.vmem %s473_s23, 2048  ;;  %p2540_p10 = scmp.lt.s32.totalorder %s473_s23, %s473_s23 }
  0x9c   : > { %p2533_p5 = scmp.ne.s32.totalorder %s473_s23, %s2532_s19  ;;  %p2541_p11 = scmp.lt.s32.totalorder %s2532_s19, %s2532_s19 }
  0x9e   : > { %p2535_p7 = pnand %p2533_p5, %p2993_p8  ;;  %p2542_p12 = por %p2541_p11, %p2540_p10 }
  0xa0   : > { %p2536_p9 = pneg %p2535_p7 }
  0xa2   : > { %p2543_p4 = pnand %p2542_p12, %p2536_p9 }
  0xa4   : > { %2546 = shalt.err (!%p2543_p4)
}
  0xa5   : > { %2254 = dma.hbm_to_vmem [thread:$0]  (!%p2979_p6), %s3507_s11, 2048, %s473_s23, [#allocation22], %s2840_s0, %s2840_s0, %s2841_s15  }
  0xa6   : > { %s3531_s2 = sld [smem:[#allocation37_spill]] }
  0xac   : > { %s2547_s22 = scalar_lea.hbm %s3531_s2, 16 }
  0xad   : > { %p2548_p13 = scmp.ne.s32.totalorder %s3531_s2, %s2547_s22  ;;  %p2554_p3 = scmp.lt.u32.totalorder %s2547_s22, %s3531_s2 }
  0xaf   : > { %p2550_p0 = pnand %p2548_p13, %p2993_p8 }
  0xb1   : > { %p2551_p1 = pneg %p2550_p0 }
  0xb3   : > { %p2556_p2 = pnand %p2554_p3, %p2551_p1 }
  0xb5   : > { %2559 = shalt.err (!%p2556_p2)
}
  0xb6   : > { %s2560_s24 = scalar_lea.vmem %s369_s29, 16  ;;  %s2567_s0 = scalar_lea.vmem %s369_s29, 32 }
  0xb7   : > { %p2561_p5 = scmp.ne.s32.totalorder %s369_s29, %s2560_s24  ;;  %p2568_p10 = scmp.lt.s32.totalorder %s369_s29, %s369_s29 }
  0xb8   : > { %p2569_p11 = scmp.lt.s32.totalorder %s2567_s0, %s2560_s24 }
  0xb9   : > { %p2563_p7 = pnand %p2561_p5, %p2993_p8 }
  0xba   : > { %p2570_p12 = por %p2569_p11, %p2568_p10 }
  0xbb   : > { %p2564_p9 = pneg %p2563_p7 }
  0xbd   : > { %p2571_p4 = pnand %p2570_p12, %p2564_p9 }
  0xbf   : > { %2574 = shalt.err (!%p2571_p4)
}
  0xc0   : > { %2227 = dma.hbm_to_vmem [thread:$0]  (!%p2979_p6), %s3531_s2, 16, %s369_s29, [#allocation7]  }
  0xc1   : > { %s2846_s19 = smov [#allocation11]   ;;  %s2847_s3 = smov [#allocation14]  }
  0xc2   : > { %s392_s13 = sshll.u32 %s2846_s19, 4  ;;  %s416_s14 = sshll.u32 %s2847_s3, 4  ;;  %s393_s13 = int_to_ptr.vmem [resolvable:$true] %s392_s13  ;;  %s417_s14 = int_to_ptr.vmem [resolvable:$true] %s416_s14 }
  0xc3   : > { %s2575_s30 = scalar_lea.hbm %s3500_s4, 16 }
  0xc4   : > { %p2576_p13 = scmp.ne.s32.totalorder %s3500_s4, %s2575_s30  ;;  %p2582_p3 = scmp.lt.u32.totalorder %s2575_s30, %s3500_s4 }
  0xc6   : > { %p2578_p0 = pnand %p2576_p13, %p2993_p8 }
  0xc8   : > { %p2579_p1 = pneg %p2578_p0 }
  0xca   : > { %p2584_p2 = pnand %p2582_p3, %p2579_p1 }
  0xcc   : > { %2587 = shalt.err (!%p2584_p2)
}
  0xcd   : > { %s2588_s29 = scalar_lea.vmem %s393_s13, 16  ;;  %s2595_s0 = scalar_lea.vmem %s393_s13, 32 }
  0xce   : > { %p2589_p5 = scmp.ne.s32.totalorder %s393_s13, %s2588_s29  ;;  %p2596_p10 = scmp.lt.s32.totalorder %s393_s13, %s393_s13 }
  0xcf   : > { %p2597_p11 = scmp.lt.s32.totalorder %s2595_s0, %s2588_s29 }
  0xd0   : > { %p2591_p7 = pnand %p2589_p5, %p2993_p8 }
  0xd1   : > { %p2598_p12 = por %p2597_p11, %p2596_p10 }
  0xd2   : > { %p2592_p9 = pneg %p2591_p7 }
  0xd4   : > { %p2599_p4 = pnand %p2598_p12, %p2592_p9 }
  0xd6   : > { %2602 = shalt.err (!%p2599_p4)
}
  0xd7   : > { %2233 = dma.hbm_to_vmem [thread:$0]  (!%p2979_p6), %s3500_s4, 16, %s393_s13, [#allocation10]  }
  0xd8   : > { %s2603_s21 = scalar_lea.hbm %s3502_s6, 16 }
  0xd9   : > { %p2604_p13 = scmp.ne.s32.totalorder %s3502_s6, %s2603_s21  ;;  %p2610_p3 = scmp.lt.u32.totalorder %s2603_s21, %s3502_s6 }
  0xdb   : > { %p2606_p0 = pnand %p2604_p13, %p2993_p8 }
  0xdd   : > { %p2607_p1 = pneg %p2606_p0 }
  0xdf   : > { %p2612_p2 = pnand %p2610_p3, %p2607_p1 }
  0xe1   : > { %2615 = shalt.err (!%p2612_p2)
}
  0xe2   : > { %s2616_s20 = scalar_lea.vmem %s417_s14, 16  ;;  %s2623_s13 = scalar_lea.vmem %s417_s14, 32 }
  0xe3   : > { %p2617_p5 = scmp.ne.s32.totalorder %s417_s14, %s2616_s20  ;;  %p2624_p10 = scmp.lt.s32.totalorder %s417_s14, %s417_s14 }
  0xe4   : > { %p2625_p11 = scmp.lt.s32.totalorder %s2623_s13, %s2616_s20 }
  0xe5   : > { %p2619_p7 = pnand %p2617_p5, %p2993_p8 }
  0xe6   : > { %p2626_p12 = por %p2625_p11, %p2624_p10 }
  0xe7   : > { %p2620_p9 = pneg %p2619_p7 }
  0xe9   : > { %p2627_p4 = pnand %p2626_p12, %p2620_p9 }
  0xeb   : > { %2630 = shalt.err (!%p2627_p4)
}
  0xec   : > { %2239 = dma.hbm_to_vmem [thread:$0]  (!%p2979_p6), %s3502_s6, 16, %s417_s14, [#allocation13]  }
  0xed   : > { %s2848_s0 = smov [#allocation17]   ;;  %s2849_s23 = smov [#allocation20]  }
  0xee   : > { %s438_s15 = sshll.u32 %s2848_s0, 4  ;;  %s462_s19 = sshll.u32 %s2849_s23, 4  ;;  %s439_s15 = int_to_ptr.vmem [resolvable:$true] %s438_s15  ;;  %s463_s19 = int_to_ptr.vmem [resolvable:$true] %s462_s19 }
  0xef   : > { %s2631_s22 = scalar_lea.hbm %s3504_s8, 16 }
  0xf0   : > { %p2632_p13 = scmp.ne.s32.totalorder %s3504_s8, %s2631_s22  ;;  %p2638_p3 = scmp.lt.u32.totalorder %s2631_s22, %s3504_s8 }
  0xf2   : > { %p2634_p0 = pnand %p2632_p13, %p2993_p8 }
  0xf4   : > { %p2635_p1 = pneg %p2634_p0 }
  0xf6   : > { %p2640_p2 = pnand %p2638_p3, %p2635_p1 }
  0xf8   : > { %2643 = shalt.err (!%p2640_p2)
}
  0xf9   : > { %s2644_s14 = scalar_lea.vmem %s439_s15, 16  ;;  %s2651_s13 = scalar_lea.vmem %s439_s15, 32 }
  0xfa   : > { %p2645_p5 = scmp.ne.s32.totalorder %s439_s15, %s2644_s14  ;;  %p2652_p10 = scmp.lt.s32.totalorder %s439_s15, %s439_s15 }
  0xfb   : > { %p2653_p11 = scmp.lt.s32.totalorder %s2651_s13, %s2644_s14 }
  0xfc   : > { %p2647_p7 = pnand %p2645_p5, %p2993_p8 }
  0xfd   : > { %p2654_p12 = por %p2653_p11, %p2652_p10 }
  0xfe   : > { %p2648_p9 = pneg %p2647_p7 }
 0x100   : > { %p2655_p4 = pnand %p2654_p12, %p2648_p9 }
 0x102   : > { %2658 = shalt.err (!%p2655_p4)
}
 0x103   : > { %2245 = dma.hbm_to_vmem [thread:$0]  (!%p2979_p6), %s3504_s8, 16, %s439_s15, [#allocation16]  }
 0x104   : > { %s2659_s3 = scalar_lea.hbm %s3506_s10, 16 }
 0x105   : > { %p2660_p13 = scmp.ne.s32.totalorder %s3506_s10, %s2659_s3  ;;  %p2666_p3 = scmp.lt.u32.totalorder %s2659_s3, %s3506_s10 }
 0x107   : > { %p2662_p0 = pnand %p2660_p13, %p2993_p8 }
 0x109   : > { %p2663_p1 = pneg %p2662_p0 }
 0x10b   : > { %p2668_p2 = pnand %p2666_p3, %p2663_p1 }
 0x10d   : > { %2671 = shalt.err (!%p2668_p2)
}
 0x10e   : > { %s2672_s1 = scalar_lea.vmem %s463_s19, 16  ;;  %s2679_s15 = scalar_lea.vmem %s463_s19, 32 }
 0x10f   : > { %p2673_p5 = scmp.ne.s32.totalorder %s463_s19, %s2672_s1  ;;  %p2680_p10 = scmp.lt.s32.totalorder %s463_s19, %s463_s19 }
 0x110   : > { %p2681_p11 = scmp.lt.s32.totalorder %s2679_s15, %s2672_s1 }
 0x111   : > { %p2675_p7 = pnand %p2673_p5, %p2993_p8 }
 0x112   : > { %p2682_p12 = por %p2681_p11, %p2680_p10 }
 0x113   : > { %p2676_p9 = pneg %p2675_p7 }
 0x115   : > { %p2683_p4 = pnand %p2682_p12, %p2676_p9 }
 0x117   : > { %2686 = shalt.err (!%p2683_p4)
}
 0x118   : > { %2251 = dma.hbm_to_vmem [thread:$0]  (!%p2979_p6), %s3506_s10, 16, %s463_s19, [#allocation19]  }
 0x119   : > { %s2850_s13 = smov [#allocation23]   ;;  %s2687_s23 = scalar_lea.hbm %s3508_s12, 16 }
 0x11a   : > { %s486_s24 = sshll.u32 %s2850_s13, 4  ;;  %p2688_p13 = scmp.ne.s32.totalorder %s3508_s12, %s2687_s23  ;;  %s487_s24 = int_to_ptr.vmem [resolvable:$true] %s486_s24 }
 0x11b   : > { %p2694_p3 = scmp.lt.u32.totalorder %s2687_s23, %s3508_s12 }
 0x11c   : > { %p2690_p0 = pnand %p2688_p13, %p2993_p8 }
 0x11e   : > { %p2691_p1 = pneg %p2690_p0 }
 0x120   : > { %p2696_p2 = pnand %p2694_p3, %p2691_p1 }
 0x122   : > { %2699 = shalt.err (!%p2696_p2)
}
 0x123   : > { %s2700_s19 = scalar_lea.vmem %s487_s24, 16  ;;  %s2707_s17 = scalar_lea.vmem %s487_s24, 32 }
 0x124   : > { %p2701_p5 = scmp.ne.s32.totalorder %s487_s24, %s2700_s19  ;;  %p2708_p10 = scmp.lt.s32.totalorder %s487_s24, %s487_s24 }
 0x125   : > { %p2709_p11 = scmp.lt.s32.totalorder %s2707_s17, %s2700_s19 }
 0x126   : > { %p2703_p7 = pnand %p2701_p5, %p2993_p8 }
 0x127   : > { %p2710_p12 = por %p2709_p11, %p2708_p10 }
 0x128   : > { %p2704_p9 = pneg %p2703_p7 }
 0x12a   : > { %p2711_p4 = pnand %p2710_p12, %p2704_p9 }
 0x12c   : > { %2714 = shalt.err (!%p2711_p4)
}
 0x12d   : > { %s3532_s16 = sld [smem:[#allocation33_spill]]  ;;  %s1911_s20 = sadd.s32 4294967294, %s2835_s28  }
 0x12e   : > { %2257 = dma.hbm_to_vmem [thread:$0]  (!%p2979_p6), %s3508_s12, 16, %s487_s24, [#allocation22]  }
 0x12f   : > { %s3237_s18 = sadd.s32 1, %s2835_s28   ;;  %s42_s13 = sadd.s32 1, %s2831_s27 }
 0x130   : > { %s39_s14 = ssub.s32 %s2835_s28, %s3237_s18  ;;  %p49_p13 = scmp.ne.s32.totalorder %s2831_s27, %s2827_s26 }
 0x131   : > { %p40_p8 = scmp.eq.s32.totalorder %s39_s14, 0  ;;  %p50_p0 = scmp.eq.s32.totalorder %s2835_s28, 0 }
 0x132   : > { %p55_p1 = scmp.ne.s32.totalorder %s2827_s26, %s2823_s25  ;;  %p337_p7 = scmp.eq.s32.totalorder %s1911_s20, 1 }
 0x133   : > { %s3248_s29 = scalar_select %p40_p8, %s2831_s27, %s42_s13  }
 0x134   : > { %p3250_p3 = por %p50_p0, %p49_p13  ;;  %p3534_p2 = scmp.eq.s32.totalorder %s3532_s16, 0 }
 0x135   : > { %p331_p5 = scmp.eq.s32.totalorder %s3532_s16, 1  ;;  %p2278_p9 = scmp.lt.s32.totalorder %s2835_s28, 2 }
 0x136   : > { %p3256_p6 = por %p3534_p2, %p55_p1  ;;  %s497_s23 = sand.u32 1, %s2831_s27  }
 0x137   : > { %p3263_p10 = por %p331_p5, %p49_p13  ;;  %p3267_p11 = por %p337_p7, %p55_p1 }
 0x138   : > { %s1926_s22 = sshll.u32 %s497_s23, 3  ;;  %s1927_s30 = sshll.u32 %s2835_s28, 7 }
 0x139   : > { %s3536_s3 = scalar_select %p3263_p10, 1, 0 }
 0x13a   : > { %s3537_s21 = scalar_select %p3267_p11, 1, 0 }
 0x13b   : > { %s3538_s1 = sld [smem:[#allocation35_spill]]  ;;  %s501_s16 = scalar_lea.vmem [#allocation3], %s1926_s22 }
 0x13c   : > { %s508_s20 = sshll.u32 %s501_s16, 4  ;;  %p3281_p12 = pnand %p2278_p9, %p3250_p3  ;;  %s3277_s20 = int_to_ptr.vmem [resolvable:$true] %s508_s20 }
 0x13d   : > { %s498_s13 = scalar_lea.sflag [#allocation4], %s497_s23 }
 0x13e   : > { %p2717_p8 = pneg %p3281_p12 }
 0x141   : > { %s3275_s15 = scalar_lea.hbm %s3538_s1, %s1927_s30  ;;  %s2720_s19 = scalar_lea.hbm %s3538_s1, 256 }
 0x142   : > { %s2715_s2 = scalar_lea.hbm %s3275_s15, 128  ;;  %p2721_p1 = scmp.lt.u32.totalorder %s3275_s15, %s3538_s1 }
 0x143   : > { %p2716_p4 = scmp.ne.s32.totalorder %s3275_s15, %s2715_s2  ;;  %p2722_p3 = scmp.lt.u32.totalorder %s2720_s19, %s2715_s2 }
 0x144   : > { %p2724_p5 = scmp.lt.u32.totalorder %s2715_s2, %s3275_s15 }
 0x145   : > { %p2718_p13 = pnand %p2717_p8, %p2716_p4  ;;  %p2723_p2 = por %p2722_p3, %p2721_p1 }
 0x147   : > { %p2719_p0 = pneg %p2718_p13  ;;  %p2725_p7 = por %p2724_p5, %p2723_p2 }
 0x149   : > { %p2726_p9 = pnand %p2725_p7, %p2719_p0 }
 0x14b   : > { %2729 = shalt.err (!%p2726_p9)
}
 0x14c   : > { %s2730_s23 = scalar_lea.vmem %s3277_s20, 128  ;;  %s2851_s16 = smov [#allocation3]  }
 0x14d   : > { %p2731_p4 = scmp.ne.s32.totalorder %s3277_s20, %s2730_s23  ;;  %s2735_s22 = sshll.u32 %s2851_s16, 4  ;;  %s2736_s22 = int_to_ptr.vmem [resolvable:$false] %s2735_s22 }
 0x14e   : > { %s2737_s30 = scalar_lea.vmem %s2736_s22, 256  ;;  %p2738_p10 = scmp.lt.s32.totalorder %s3277_s20, %s2736_s22 }
 0x14f   : > { %p2733_p13 = pnand %p2731_p4, %p2717_p8  ;;  %p2739_p1 = scmp.lt.s32.totalorder %s2737_s30, %s2730_s23 }
 0x151   : > { %p2734_p11 = pneg %p2733_p13  ;;  %p2740_p3 = por %p2739_p1, %p2738_p10 }
 0x153   : > { %p2741_p2 = pnand %p2740_p3, %p2734_p11 }
 0x155   : > { %2744 = shalt.err (!%p2741_p2)
}
 0x156   : > { %2261 = dma.hbm_to_vmem [thread:$0]  (!%p3281_p12), %s3275_s15, 128, %s3277_s20, %s498_s13  }
 0x157   : > { %s3540_s2 = sld [smem:[#allocation34_spill]] }
 0x15d   : > { %p3541_p0 = scmp.ne.s32.totalorder %s3540_s2, 0 }
 0x15e   : > { %s3313_s19 = sand.u32 (!%p3541_p0), 1, %s2827_s26  }
 0x15f   : > { %517 = sbr.rel (%p3541_p0) target bundleno = 2911 (0xb5f), region = 72  ;;  %s1929_s0 = sshll.u32 (!%p3541_p0), %s3313_s19, 3 }
 0x160   : > { %s520_s17 = scalar_lea.sflag (!%p3541_p0), [#allocation4], %s3313_s19  ;;  %s523_s23 = scalar_lea.vmem (!%p3541_p0), [#allocation3], %s1929_s0 }
 0x166   : > { %2790 = dma.done.wait (%p3256_p6), %s520_s17, 128  }
 0x167   : > { %2792 = vsyncadd (%p3256_p6), %s520_s17, 4294967168  ;;  %s3542_s15 = sld [smem:[#allocation33_spill]] }
 0x16d   : > { %p3543_p10 = scmp.eq.s32.totalorder %s3542_s15, 0 }
 0x16f   : > { %2794 = dma.done.wait (%p3543_p10), [#allocation7], 32   ;;  %p3544_p11 = pmov %p3543_p10 }
 0x170   : > { %p3545_p12 = pmov %p3543_p10 }
 0x171   : > { %2796 = vsyncadd (%p3544_p11), [#allocation7], 4294967264 }
 0x172   : > { %2798 = dma.done.wait (%p3545_p12), [#allocation10], 528   ;;  %p3546_p8 = pmov %p3543_p10 }
 0x174   : > { %2800 = vsyncadd (%p3546_p8), [#allocation10], 4294966768  ;;  %p3547_p5 = pmov %p3546_p8 }
 0x176   : > { %2802 = dma.done.wait (%p3547_p5), [#allocation13], 528   ;;  %p3548_p7 = pmov %p3547_p5 }
 0x177   : > { %p3549_p6 = pmov %p3547_p5 }
 0x178   : > { %2804 = vsyncadd (%p3548_p7), [#allocation13], 4294966768 }
 0x179   : > { %2806 = dma.done.wait (%p3549_p6), [#allocation16], 32   ;;  %p3550_p9 = pmov %p3547_p5 }
 0x17a   : > { %p3551_p4 = pmov %p3547_p5 }
 0x17b   : > { %2808 = vsyncadd (%p3550_p9), [#allocation16], 4294967264 }
 0x17c   : > { %2810 = dma.done.wait (%p3551_p4), [#allocation19], 528   ;;  %p3552_p13 = pmov %p3551_p4 }
 0x17d   : > { %p3553_p1 = pmov %p3551_p4 }
 0x17e   : > { %2812 = vsyncadd (%p3552_p13), [#allocation19], 4294966768 }
 0x17f   : > { %2814 = dma.done.wait (%p3553_p1), [#allocation22], 2064   ;;  %p3554_p3 = pmov %p3553_p1 }
 0x180   : > { %vm617_vm0 = vcmask 261120   ;;  %v3347_v0 = vld [vmem:[%s523_s23] sm:$0xff]  ;;  %v646_v7 = vld [vmem:[#allocation9] sm:$0xff]  ;;  %v2852_v10 = vmov 0.0|0.0   ;;  %vm2853_vm1 = vmmov 0   ;;  %v2854_v13 = vmov 0.0  }
 0x181   : > { %2816 = vsyncadd (%p3554_p3), [#allocation22], 4294965232  ;;  %v618_v1 = vsel %vm617_vm0, %v3347_v0, 0.0  ;;  %v647_v8 = vld [vmem:[#allocation9 + $0x8] sm:$0xff]  ;;  %v648_v9 = vld [vmem:[#allocation9 + $0x10] sm:$0xff]  ;;  %2127 = vmatprep.subr.bf16.mxu1 %v2852_v10  ;;  %2027 = vmatprep.mubr.msk.f32.mxu1 %vm2853_vm1, %v2854_v13  ;;  %s2855_s24 = smov 120  }
 0x182   : > { %619 = vadd.xlane.f32.xlu0 %v618_v1  ;;  %v2128_v11 = vpack.c.bf16 %v647_v8, %v646_v7  ;;  %v649_v12 = vld [vmem:[#allocation9 + $0x18] sm:$0xff]  ;;  %2040 = vmatprep.subr.mxu0 %v2854_v13  ;;  %v1945_v24 = vld [vmem:[#allocation11] ss:$0 sm:$0xff]  ;;  %s2856_s20 = smov 96   ;;  %s2857_s14 = smov 88   ;;  %vm733_vm2 = vcmask 64512  }
 0x183   : > { %2042 = vmatprep.mubr.msk.f32.mxu0 %vm2853_vm1, %v2854_v13  ;;  %v2131_v14 = vpack.c.bf16 %v649_v12, %v648_v9  ;;  %v1943_v19 = vld [vmem:[#allocation6] ss:$0 sm:$0xff]  ;;  %v1944_v21 = vld [vmem:[#allocation8] ss:$0 sm:$0xff]  ;;  %s2858_s13 = smov 80   ;;  %s2859_s16 = smov 112  }
 0x184   : > { %2129 = vmatpush3.bf16.msra.mxu1 %v2128_v11  ;;  %s2860_s22 = smov 72   ;;  %s2861_s30 = smov 104   ;;  %vm1065_vm3 = vcmask 130112   ;;  %vm1236_vm4 = vcmask 195712   ;;  %vm1407_vm5 = vcmask 261312  }
 0x185   : > { %2130 = vmatprep.subr.bf16.mxu1 %v2852_v10  ;;  %s2862_s2 = smov 64   ;;  %s2863_s17 = smov 48  }
 0x186   : > { %s2864_s23 = smov 40   ;;  %p3556_p0 = scmp.ne.s32.totalorder %s3536_s3, 0 }
 0x188   : > { %2132 = vmatpush3.bf16.msra.mxu1 %v2131_v14 }
 0x189   : > { %2030 = vmatprep.subr.mxu1 %v2854_v13 }
 0x20f   : > { %v620_v2 = vpop.xlane.xlu0 %619 }
 0x210   : > { %v622_v3 = vmul.f32 0.03125, %v620_v2 }
 0x212   : > { %v623_v4 = vsub.f32 %v3347_v0, %v622_v3 }
 0x214   : > { %v624_v5 = vmul.f32 %v623_v4, %v623_v4 }
 0x216   : > { %v625_v6 = vsel %vm617_vm0, %v624_v5, 0.0 }
 0x217   : > { %626 = vadd.xlane.f32.xlu0 %v625_v6 }
 0x2a4   : > { %v627_v15 = vpop.xlane.xlu0 %626 }
 0x2a5   : > { %v628_v16 = vmul.f32 0.03125, %v627_v15 }
 0x2a7   : > { %v629_v17 = vadd.f32 1e-12, %v628_v16 }
 0x2a9   : > { %2355 = vrsqrt.f32 %v629_v17 }
 0x2b3   : > { %v2356_v18 = vpop.eup %2355 }
 0x2b4   : > { %v631_v20 = vmul.f32 %v2356_v18, %v623_v4 }
 0x2b6   : > { %v638_v22 = vmul.f32 %v1943_v19, %v631_v20 }
 0x2b8   : > { %v645_v23 = vadd.f32 %v1944_v21, %v638_v22 }
 0x2ba   : > { %2028 = vmatmul.mubr.msk.f32.vlgmr.msra.gmra.mrb[0].mxu1 %vm617_vm0, %v645_v23 }
 0x2bb   : > { %2032 = vmatprep.mubr.msk.f32.mxu1 %vm2853_vm1, %v2854_v13 }
 0x38d   : > { %v726_v25 = vpop.f32.mrb[0].mxu1 }
 0x38e   : > { %v3364_v26 = vadd.f32 %v1945_v24, %v726_v25  ;;  %v2029_v27 = vpop.f32.mrb[1].mxu1  ;;  %v1410_v24 = vld [vmem:[#allocation12] sm:$0xff]  ;;  %v1411_v25 = vld [vmem:[#allocation12 + $0x8] sm:$0xff] }
 0x38f   : > { %v1412_v27 = vld [vmem:[#allocation12 + $0x10] sm:$0xff] }
 0x390   : > { %896 = vrot.lane.b32.xlu0 %v3364_v26, %s2855_s24  ;;  %731 = vrot.lane.b32.xlu1 %v3364_v26, %s2856_s20  ;;  %s2865_s24 = smov 56   ;;  %s2866_s20 = smov 8  }
 0x394   : > { %898 = vrot.lane.b32.xlu1 %v3364_v26, %s2857_s14  ;;  %s2867_s14 = smov 16  }
 0x398   : > { %1069 = vrot.lane.b32.xlu1 %v3364_v26, %s2858_s13  ;;  %s2868_s13 = smov 24  }
 0x39c   : > { %1067 = vrot.lane.b32.xlu1 %v3364_v26, %s2859_s16  ;;  %s1968_s16 = sshll.u32 %s3542_s15, 7  ;;  %s1714_s15 = scalar_lea.sflag [#allocation5], %s3313_s19 }
 0x3a0   : > { %1240 = vrot.lane.b32.xlu1 %v3364_v26, %s2860_s22  ;;  %s613_s22 = scalar_lea.vmem [#allocation24], %s1929_s0  ;;  %s2869_s0 = smov [#allocation24]  }
 0x3a4   : > { %1238 = vrot.lane.b32.xlu1 %v3364_v26, %s2861_s30  ;;  %s1727_s30 = sshll.u32 %s613_s22, 4  ;;  %s3453_s30 = int_to_ptr.vmem [resolvable:$true] %s1727_s30 }
 0x402   : > { %v732_v28 = vpop.permute.xlu1 %731  ;;  %v897_v30 = vpop.permute.xlu0 %896 }
 0x403   : > { %2031 = vmatpush3.xpose.msk.msra.mxu1 %vm733_vm2, %v732_v28  ;;  %v1413_v28 = vld [vmem:[#allocation12 + $0x18] sm:$0xff] }
 0x404   : > { %2035 = vmatprep.subr.mxu1 %v2854_v13 }
 0x406   : > { %2033 = vmatmul.mubr.msk.f32.vlgmr.msra.gmra.mrb[2].mxu1 %vm733_vm2, %v3364_v26  ;;  %v899_v29 = vpop.permute.xlu1 %898 }
 0x407   : > { %2041 = vmatpush3.xpose.msk.msra.mxu0 %vm733_vm2, %v899_v29  ;;  %2037 = vmatprep.mubr.msk.f32.mxu1 %vm2853_vm1, %v2854_v13  ;;  %v2137_v29 = vpack.c.bf16 %v1413_v28, %v1412_v27  ;;  %v1963_v27 = vld [vmem:[#allocation20] ss:$0 sm:$0xff] }
 0x408   : > { %2050 = vmatprep.subr.mxu0 %v2854_v13 }
 0x40a   : > { %2043 = vmatmul.mubr.msk.f32.vlgmr.msra.gmra.mrb[0].mxu0 %vm733_vm2, %v897_v30  ;;  %v1070_v31 = vpop.permute.xlu1 %1069 }
 0x40b   : > { %2051 = vmatpush3.xpose.msk.msra.mxu0 %vm733_vm2, %v1070_v31  ;;  %2052 = vmatprep.mubr.msk.f32.mxu0 %vm2853_vm1, %v2854_v13 }
 0x40c   : > { %2060 = vmatprep.subr.mxu0 %v2854_v13 }
 0x40e   : > { %v1068_v32 = vpop.permute.xlu1 %1067 }
 0x40f   : > { %2053 = vmatmul.mubr.msk.f32.vlgmr.msra.gmra.mrb[2].mxu0 %vm733_vm2, %v1068_v32 }
 0x410   : > { %2062 = vmatprep.mubr.msk.f32.mxu0 %vm2853_vm1, %v2854_v13 }
 0x412   : > { %v1241_v33 = vpop.permute.xlu1 %1240 }
 0x413   : > { %2061 = vmatpush3.xpose.msk.msra.mxu0 %vm733_vm2, %v1241_v33 }
 0x414   : > { %2145 = vmatprep.subr.bf16.mxu0 %v2852_v10 }
 0x416   : > { %v1239_v34 = vpop.permute.xlu1 %1238 }
 0x417   : > { %2063 = vmatmul.mubr.msk.f32.vlgmr.msra.gmra.mrb[4].mxu0 %vm733_vm2, %v1239_v34 }
 0x418   : > { %2124 = vmatprep.mubr.msk.f32.mxu0 %vm2853_vm1, %v2854_v13 }
 0x4d9   : > { %v804_v35 = vpop.f32.mrb[2].mxu1 }
 0x4da   : > { %v2034_v36 = vpop.f32.mrb[3].mxu1  ;;  %v808_v37 = vsel %vm733_vm2, %v804_v35, -inf }
 0x4db   : > { %809 = vmax.xlane.f32.xlu1 %v808_v37 }
 0x4dd   : > { %v970_v38 = vpop.f32.mrb[0].mxu0 }
 0x4de   : > { %v2044_v39 = vpop.f32.mrb[1].mxu0  ;;  %v974_v40 = vsel %vm733_vm2, %v970_v38, -inf }
 0x4df   : > { %975 = vmax.xlane.f32.xlu0 %v974_v40 }
 0x4e2   : > { %v1141_v41 = vpop.f32.mrb[2].mxu0 }
 0x4e3   : > { %v2054_v42 = vpop.f32.mrb[3].mxu0  ;;  %v1145_v43 = vsel %vm733_vm2, %v1141_v41, -inf }
 0x4e4   : > { %1146 = vmax.xlane.f32.xlu1 %v1145_v43 }
 0x4ea   : > { %v1312_v44 = vpop.f32.mrb[4].mxu0 }
 0x4eb   : > { %v2064_v45 = vpop.f32.mrb[5].mxu0  ;;  %v1316_v46 = vsel %vm733_vm2, %v1312_v44, -inf }
 0x4ec   : > { %1317 = vmax.xlane.f32.xlu0 %v1316_v46 }
 0x4f5   : > { %819 = vrot.lane.b32.xlu1 %v3364_v26, %s2862_s2 }
 0x568   : > { %v810_v47 = vpop.xlane.xlu1 %809 }
 0x569   : > { %v811_v48 = vsub.f32 %v804_v35, %v810_v47 }
 0x56b   : > { %v812_v49 = vmul.f32 1.442695, %v811_v48 }
 0x56c   : > { %v976_v50 = vpop.xlane.xlu0 %975 }
 0x56d   : > { %2357 = vpow2.f32 %v812_v49  ;;  %v977_v51 = vsub.f32 %v970_v38, %v976_v50 }
 0x56f   : > { %v978_v52 = vmul.f32 1.442695, %v977_v51  ;;  %v1526_v51 = vld [vmem:[#allocation18 + $0x8] sm:$0xff] }
 0x571   : > { %2359 = vpow2.f32 %v978_v52  ;;  %v1147_v53 = vpop.xlane.xlu1 %1146 }
 0x572   : > { %v1148_v54 = vsub.f32 %v1141_v41, %v1147_v53  ;;  %v1960_v41 = vld [vmem:[#allocation14] ss:$0 sm:$0xff] }
 0x573   : > { %v1528_v53 = vld [vmem:[#allocation18 + $0x18] sm:$0xff] }
 0x574   : > { %v1149_v55 = vmul.f32 1.442695, %v1148_v54 }
 0x575   : > { %v820_v56 = vpop.permute.xlu1 %819 }
 0x576   : > { %2361 = vpow2.f32 %v1149_v55  ;;  %2036 = vmatpush3.msra.mxu1 %v820_v56 }
 0x577   : > { %v2358_v57 = vpop.eup %2357  ;;  %2045 = vmatprep.subr.mxu1 %v2854_v13 }
 0x578   : > { %v814_v58 = vsel %vm733_vm2, %v2358_v57, 0.0 }
 0x579   : > { %v1318_v59 = vpop.xlane.xlu0 %1317  ;;  %815 = vadd.xlane.f32.xlu1 %v814_v58 }
 0x57a   : > { %v1319_v60 = vsub.f32 %v1312_v44, %v1318_v59  ;;  %v1961_v59 = vld [vmem:[#allocation15] ss:$0 sm:$0xff] }
 0x57b   : > { %v2360_v61 = vpop.eup %2359 }
 0x57c   : > { %v1320_v62 = vmul.f32 1.442695, %v1319_v60  ;;  %v980_v63 = vsel %vm733_vm2, %v2360_v61, 0.0 }
 0x57d   : > { %981 = vadd.xlane.f32.xlu0 %v980_v63 }
 0x57e   : > { %2363 = vpow2.f32 %v1320_v62 }
 0x580   : > { %v2362_v1 = vpop.eup %2361 }
 0x581   : > { %v1151_v2 = vsel %vm733_vm2, %v2362_v1, 0.0 }
 0x582   : > { %1152 = vadd.xlane.f32.xlu1 %v1151_v2  ;;  %v1618_v2 = vld [vmem:[#allocation21 + $0x8] sm:$0xff] }
 0x588   : > { %v2364_v3 = vpop.eup %2363 }
 0x589   : > { %v1322_v4 = vsel %vm733_vm2, %v2364_v3, 0.0 }
 0x58a   : > { %1323 = vadd.xlane.f32.xlu0 %v1322_v4  ;;  %v1619_v4 = vld [vmem:[#allocation21 + $0x10] sm:$0xff] }
 0x593   : > { %1156 = vrot.lane.b32.xlu1 %v3364_v26, %s2863_s17 }
 0x597   : > { %1327 = vrot.lane.b32.xlu1 %v3364_v26, %s2864_s23  ;;  %s3555_s23 = sld [smem:[#allocation39_spill]] }
 0x5a0   : > { %985 = vrot.lane.b32.xlu0 %v3364_v26, %s2865_s24  ;;  %v2134_v26 = vpack.c.bf16 %v1411_v25, %v1410_v24  ;;  %v1631_v24 = vld [vmem:[#allocation21 + $0x70] sm:$0xff]  ;;  %v1632_v25 = vld [vmem:[#allocation21 + $0x78] sm:$0xff]  ;;  %s3451_s24 = scalar_lea.hbm %s3555_s23, %s1968_s16 }
 0x606   : > { %v816_v5 = vpop.xlane.xlu1 %815 }
 0x607   : > { %2365 = vrcp.f32 %v816_v5  ;;  %v1620_v5 = vld [vmem:[#allocation21 + $0x18] sm:$0xff] }
 0x60a   : > { %v982_v6 = vpop.xlane.xlu0 %981 }
 0x60b   : > { %2367 = vrcp.f32 %v982_v6  ;;  %v2149_v6 = vpack.c.bf16 %v1620_v5, %v1619_v4 }
 0x60f   : > { %v1153_v7 = vpop.xlane.xlu1 %1152 }
 0x610   : > { %2369 = vrcp.f32 %v1153_v7  ;;  %v1621_v7 = vld [vmem:[#allocation21 + $0x20] sm:$0xff] }
 0x611   : > { %v2366_v8 = vpop.eup %2365 }
 0x612   : > { %v818_v9 = vmul.f32 %v2366_v8, %v2358_v57  ;;  %v1622_v8 = vld [vmem:[#allocation21 + $0x28] sm:$0xff] }
 0x613   : > { %v1157_v15 = vpop.permute.xlu1 %1156 }
 0x614   : > { %2038 = vmatmul.mubr.msk.f32.vlgmr.msra.gmra.mrb[4].mxu1 %vm733_vm2, %v818_v9  ;;  %v2152_v9 = vpack.c.bf16 %v1622_v8, %v1621_v7 }
 0x615   : > { %2047 = vmatprep.mubr.msk.f32.mxu1 %vm2853_vm1, %v2854_v13  ;;  %v2368_v12 = vpop.eup %2367 }
 0x616   : > { %v984_v14 = vmul.f32 %v2368_v12, %v2360_v61  ;;  %v1962_v61 = vld [vmem:[#allocation17] ss:$0 sm:$0xff] }
 0x617   : > { %v1324_v11 = vpop.xlane.xlu0 %1323  ;;  %v1328_v19 = vpop.permute.xlu1 %1327  ;;  %v1624_v12 = vld [vmem:[#allocation21 + $0x38] sm:$0xff] }
 0x618   : > { %2371 = vrcp.f32 %v1324_v11  ;;  %v1623_v11 = vld [vmem:[#allocation21 + $0x30] sm:$0xff] }
 0x61a   : > { %v2370_v17 = vpop.eup %2369 }
 0x61b   : > { %v986_v16 = vpop.permute.xlu0 %985  ;;  %v1155_v18 = vmul.f32 %v2370_v17, %v2362_v1  ;;  %v1617_v1 = vld [vmem:[#allocation21] sm:$0xff] }
 0x61c   : > { %2046 = vmatpush3.msra.mxu1 %v986_v16  ;;  %v1626_v16 = vld [vmem:[#allocation21 + $0x48] sm:$0xff] }
 0x61d   : > { %2048 = vmatmul.mubr.msk.f32.vlgmr.msra.gmra.mrb[6].mxu1 %vm733_vm2, %v984_v14  ;;  %2055 = vmatprep.subr.mxu1 %v2854_v13  ;;  %v2155_v14 = vpack.c.bf16 %v1624_v12, %v1623_v11 }
 0x61e   : > { %2056 = vmatpush3.msra.mxu1 %v1157_v15  ;;  %2057 = vmatprep.mubr.msk.f32.mxu1 %vm2853_vm1, %v2854_v13  ;;  %v1625_v15 = vld [vmem:[#allocation21 + $0x40] sm:$0xff] }
 0x61f   : > { %2065 = vmatprep.subr.mxu1 %v2854_v13  ;;  %v2158_v17 = vpack.c.bf16 %v1626_v16, %v1625_v15 }
 0x621   : > { %2058 = vmatmul.mubr.msk.f32.vlgmr.msra.gmra.mrb[8].mxu1 %vm733_vm2, %v1155_v18  ;;  %v1627_v18 = vld [vmem:[#allocation21 + $0x50] sm:$0xff] }
 0x622   : > { %v2372_v20 = vpop.eup %2371  ;;  %2066 = vmatpush3.msra.mxu1 %v1328_v19  ;;  %2067 = vmatprep.mubr.msk.f32.mxu1 %vm2853_vm1, %v2854_v13  ;;  %v1628_v19 = vld [vmem:[#allocation21 + $0x58] sm:$0xff] }
 0x623   : > { %v1326_v21 = vmul.f32 %v2372_v20, %v2364_v3  ;;  %2133 = vmatprep.subr.bf16.mxu1 %v2852_v10  ;;  %v2146_v3 = vpack.c.bf16 %v1618_v2, %v1617_v1  ;;  %v2161_v20 = vpack.c.bf16 %v1628_v19, %v1627_v18 }
 0x625   : > { %2068 = vmatmul.mubr.msk.f32.vlgmr.msra.gmra.mrb[10].mxu1 %vm733_vm2, %v1326_v21  ;;  %2147 = vmatpush3.bf16.msra.mxu0 %v2146_v3  ;;  %v1629_v21 = vld [vmem:[#allocation21 + $0x60] sm:$0xff] }
 0x626   : > { %2078 = vmatprep.mubr.msk.f32.mxu1 %vm2853_vm1, %v2854_v13  ;;  %2135 = vmatpush3.bf16.msra.mxu1 %v2134_v26  ;;  %v2167_v26 = vpack.c.bf16 %v1632_v25, %v1631_v24 }
 0x627   : > { %2136 = vmatprep.subr.bf16.mxu1 %v2852_v10  ;;  %2148 = vmatprep.subr.bf16.mxu0 %v2852_v10 }
 0x629   : > { %2150 = vmatpush3.bf16.msra.mxu0 %v2149_v6 }
 0x62a   : > { %2138 = vmatpush3.bf16.msra.mxu1 %v2137_v29  ;;  %2151 = vmatprep.subr.bf16.mxu0 %v2852_v10 }
 0x62b   : > { %2139 = vmatprep.subr.bf16.mxu1 %v2852_v10 }
 0x62d   : > { %2153 = vmatpush3.bf16.msra.mxu0 %v2152_v9 }
 0x62e   : > { %2154 = vmatprep.subr.bf16.mxu0 %v2852_v10 }
 0x631   : > { %2156 = vmatpush3.bf16.msra.mxu0 %v2155_v14 }
 0x632   : > { %2157 = vmatprep.subr.bf16.mxu0 %v2852_v10 }
 0x635   : > { %2159 = vmatpush3.bf16.msra.mxu0 %v2158_v17 }
 0x636   : > { %2160 = vmatprep.subr.bf16.mxu0 %v2852_v10 }
 0x639   : > { %2162 = vmatpush3.bf16.msra.mxu0 %v2161_v20 }
 0x63a   : > { %2163 = vmatprep.subr.bf16.mxu0 %v2852_v10 }
 0x6e7   : > { %v891_v22 = vpop.f32.mrb[4].mxu1 }
 0x6e8   : > { %895 = vst.msk [vmem:[#allocation2] sm:$0xff] %vm733_vm2, %v891_v22  ;;  %v2039_v23 = vpop.f32.mrb[5].mxu1  ;;  %v1630_v22 = vld [vmem:[#allocation21 + $0x68] sm:$0xff] }
 0x6e9   : > { %v2164_v23 = vpack.c.bf16 %v1630_v22, %v1629_v21 }
 0x6eb   : > { %2165 = vmatpush3.bf16.msra.mxu0 %v2164_v23 }
 0x6ec   : > { %2166 = vmatprep.subr.bf16.mxu0 %v2852_v10 }
 0x6ef   : > { %2168 = vmatpush3.bf16.msra.mxu0 %v2167_v26 }
 0x6f0   : > { %v1057_v30 = vpop.f32.mrb[6].mxu1 }
 0x6f1   : > { %1062 = vrot.lane.b32.xlu0 %v1057_v30, %s2866_s20  ;;  %v2049_v31 = vpop.f32.mrb[7].mxu1  ;;  %s2745_s20 = scalar_lea.vmem %s3453_s30, 128 }
 0x6f2   : > { %p2746_p2 = scmp.ne.s32.totalorder %s3453_s30, %s2745_s20 }
 0x6f4   : > { %v1228_v32 = vpop.f32.mrb[8].mxu1  ;;  %p2747_p10 = pnand %p2746_p2, %p3556_p0 }
 0x6f5   : > { %1233 = vrot.lane.b32.xlu1 %v1228_v32, %s2867_s14  ;;  %v2059_v33 = vpop.f32.mrb[9].mxu1  ;;  %s2749_s14 = sshll.u32 %s2869_s0, 4  ;;  %s2750_s14 = int_to_ptr.vmem [resolvable:$false] %s2749_s14 }
 0x6f6   : > { %p2748_p11 = pneg %p2747_p10  ;;  %p2752_p12 = scmp.lt.s32.totalorder %s3453_s30, %s2750_s14 }
 0x6f8   : > { %v1399_v34 = vpop.f32.mrb[10].mxu1 }
 0x6f9   : > { %1404 = vrot.lane.b32.xlu0 %v1399_v34, %s2868_s13  ;;  %v2069_v35 = vpop.f32.mrb[11].mxu1  ;;  %s2751_s13 = scalar_lea.vmem %s2750_s14, 256 }
 0x6fa   : > { %p2753_p8 = scmp.lt.s32.totalorder %s2751_s13, %s2745_s20 }
 0x6fc   : > { %p2754_p5 = por %p2753_p8, %p2752_p12 }
 0x6fe   : > { %p2755_p7 = pnand %p2754_p5, %p2748_p11 }
 0x763   : > { %v1063_v36 = vpop.permute.xlu0 %1062 }
 0x764   : > { %1066 = vst.msk [vmem:[#allocation2] sm:$0xff] %vm1065_vm3, %v1063_v36 }
 0x767   : > { %v1234_v37 = vpop.permute.xlu1 %1233 }
 0x768   : > { %1237 = vst.msk [vmem:[#allocation2] sm:$0xff] %vm1236_vm4, %v1234_v37  ;;  %v1966_v37 = vld [vmem:[#allocation23] ss:$0 sm:$0xff] }
 0x76b   : > { %v1405_v38 = vpop.permute.xlu0 %1404 }
 0x76c   : > { %1408 = vst.msk [vmem:[#allocation2] sm:$0xff] %vm1407_vm5, %v1405_v38 }
 0x773   : > { %v1409_v39 = vld [vmem:[#allocation2] sm:$0xff] }
 0x774   : > { %2079 = vmatmul.mubr.msk.f32.vlgmr.msra.gmra.mrb[12].mxu1 %vm617_vm0, %v1409_v39 }
 0x775   : > { %2089 = vmatprep.mubr.msk.f32.mxu1 %vm2853_vm1, %v2854_v13  ;;  %v1525_v13 = vld [vmem:[#allocation18] sm:$0xff] }
 0x776   : > { %v2140_v52 = vpack.c.bf16 %v1526_v51, %v1525_v13 }
 0x778   : > { %2141 = vmatpush3.bf16.msra.mxu1 %v2140_v52 }
 0x779   : > { %2142 = vmatprep.subr.bf16.mxu1 %v2852_v10 }
 0x847   : > { %v1483_v40 = vpop.f32.mrb[12].mxu1 }
 0x848   : > { %v1487_v42 = vadd.f32 %v1483_v40, %v3347_v0  ;;  %v2080_v43 = vpop.f32.mrb[13].mxu1  ;;  %v1527_v0 = vld [vmem:[#allocation18 + $0x10] sm:$0xff] }
 0x849   : > { %v2143_v54 = vpack.c.bf16 %v1528_v53, %v1527_v0 }
 0x84a   : > { %v3429_v44 = vadd.f32 %v1960_v41, %v1487_v42 }
 0x84b   : > { %2144 = vmatpush3.bf16.msra.mxu1 %v2143_v54 }
 0x84c   : > { %v1498_v45 = vsel %vm617_vm0, %v3429_v44, 0.0 }
 0x84d   : > { %1499 = vadd.xlane.f32.xlu1 %v1498_v45 }
 0x8da   : > { %v1500_v46 = vpop.xlane.xlu1 %1499 }
 0x8db   : > { %v1501_v47 = vmul.f32 0.03125, %v1500_v46 }
 0x8dd   : > { %v1502_v48 = vsub.f32 %v3429_v44, %v1501_v47 }
 0x8df   : > { %v1503_v49 = vmul.f32 %v1502_v48, %v1502_v48 }
 0x8e1   : > { %v1504_v50 = vsel %vm617_vm0, %v1503_v49, 0.0 }
 0x8e2   : > { %1505 = vadd.xlane.f32.xlu0 %v1504_v50 }
 0x96f   : > { %v1506_v55 = vpop.xlane.xlu0 %1505 }
 0x970   : > { %v1507_v56 = vmul.f32 0.03125, %v1506_v55 }
 0x972   : > { %v1508_v57 = vadd.f32 1e-12, %v1507_v56 }
 0x974   : > { %2373 = vrsqrt.f32 %v1508_v57 }
 0x97e   : > { %v2374_v58 = vpop.eup %2373 }
 0x97f   : > { %v1510_v60 = vmul.f32 %v2374_v58, %v1502_v48 }
 0x981   : > { %v1517_v62 = vmul.f32 %v1961_v59, %v1510_v60 }
 0x983   : > { %v1524_v63 = vadd.f32 %v1962_v61, %v1517_v62 }
 0x985   : > { %2090 = vmatmul.mubr.msk.f32.vlgmr.msra.gmra.mrb[14].mxu1 %vm617_vm0, %v1524_v63 }
 0xa58   : > { %v1605_v28 = vpop.f32.mrb[14].mxu1 }
 0xa59   : > { %v1606_v29 = vadd.f32 %v1963_v27, %v1605_v28  ;;  %v2091_v30 = vpop.f32.mrb[15].mxu1 }
 0xa5b   : > { %v1965_v31 = vmul.f32 -1.702, %v1606_v29 }
 0xa5d   : > { %v1611_v32 = vmul.f32 1.442695, %v1965_v31 }
 0xa5f   : > { %2375 = vpow2.f32 %v1611_v32 }
 0xa69   : > { %v2376_v33 = vpop.eup %2375 }
 0xa6a   : > { %v1613_v34 = vadd.f32 1.0, %v2376_v33 }
 0xa6c   : > { %2377 = vrcp.f32 %v1613_v34 }
 0xa76   : > { %v2378_v35 = vpop.eup %2377 }
 0xa77   : > { %v1616_v36 = vmul.f32 %v2378_v35, %v1606_v29 }
 0xa79   : > { %2125 = vmatmul.mubr.f32.vlgmr.msra.gmra.mrb[6].mxu0 %v1616_v36 }
 0xb4c   : > { %v1699_v10 = vpop.f32.mrb[6].mxu0 }
 0xb4d   : > { %v1703_v38 = vadd.f32 %v1699_v10, %v3429_v44  ;;  %v2126_v39 = vpop.f32.mrb[7].mxu0 }
 0xb4f   : > { %v1711_v40 = vadd.f32 %v1966_v37, %v1703_v38 }
 0xb51   : > { %1712 = vst.msk [vmem:[%s613_s22] sm:$0xff] %vm617_vm0, %v1711_v40 }
 0xb52   : > { %2758 = shalt.err (!%p2755_p7)
}
 0xb53   : > { %s2759_s19 = scalar_lea.hbm %s3451_s24, 128  ;;  %s2763_s2 = scalar_lea.hbm %s3555_s23, 256 }
 0xb54   : > { %p2760_p6 = scmp.ne.s32.totalorder %s3451_s24, %s2759_s19  ;;  %p2764_p13 = scmp.lt.u32.totalorder %s3451_s24, %s3555_s23 }
 0xb55   : > { %p2765_p1 = scmp.lt.u32.totalorder %s2763_s2, %s2759_s19  ;;  %p2767_p2 = scmp.lt.u32.totalorder %s2759_s19, %s3451_s24 }
 0xb56   : > { %p2761_p9 = pnand %p2760_p6, %p3556_p0 }
 0xb57   : > { %p2766_p3 = por %p2765_p1, %p2764_p13 }
 0xb58   : > { %p2762_p4 = pneg %p2761_p9 }
 0xb59   : > { %p2768_p10 = por %p2767_p2, %p2766_p3 }
 0xb5b   : > { %p2769_p11 = pnand %p2768_p10, %p2762_p4 }
 0xb5d   : > { %2772 = shalt.err (!%p2769_p11)
}
 0xb5e   : > { %2219 = dma.vmem_to_hbm [thread:$0]  (%p3556_p0), %s3453_s30, 128, %s3451_s24, %s1714_s15  }
 0xb5f PF: > { %s1739_s20 = sand.u32 1, %s2823_s25   ;;  %p3557_p12 = scmp.ne.s32.totalorder %s3537_s21, 0 }
 0xb60   : > { %p3558_p8 = scmp.ge.s32.totalorder %s2835_s28, 2  ;;  %s1740_s14 = scalar_lea.sflag [#allocation5], %s1739_s20 }
 0xb62   : > { %p2263_p5 = pnand %p3558_p8, %p3557_p12 }
 0xb64   : > { %2818 = dma.done.wait (!%p2263_p5), %s1740_s14, 128  }
 0xb65   : > { %2820 = vsyncadd (!%p2263_p5), %s1740_s14, 4294967168  ;;  %p32_p7 = scmp.ge.s32.totalorder %s3237_s18, 4   ;;  %s3559_s25 = smov %s2827_s26 }
 0xb66   : > { %s3560_s26 = smov %s2831_s27  ;;  %s3561_s27 = smov %s3248_s29 }
 0xb67   : > { %s3562_s28 = smov %s3237_s18  ;;  %34 = sbr.rel (!%p32_p7) target bundleno = 17 (0x11), region = 165 }
 0xb6e   :  { %1745 = vsyncpa [#allocation4], 1 }
 0xb6f   :  { %1747 = vsyncpa [#allocation4 + $0x1], 1 }
 0xb70   :  { %1748 = vsyncpa [#allocation7], 1 }
 0xb71   :  { %1749 = vsyncpa [#allocation10], 1 }
 0xb72   :  { %1750 = vsyncpa [#allocation13], 1 }
 0xb73   :  { %1751 = vsyncpa [#allocation16], 1 }
 0xb74   :  { %1752 = vsyncpa [#allocation19], 1 }
 0xb75   :  { %1753 = vsyncpa [#allocation22], 1 }
 0xb76   :  { %1754 = vsyncpa [#allocation5], 1 }
 0xb77   :  { %1756 = vsyncpa [#allocation5 + $0x1], 1 }

</bundles_post_ra>
